<compile_context>
chip_gen: v7x
topology: tpu7x:2x2x1
jax: 0.10.0
libtpu: 0.0.40
codegen_flags: <defaults>
</compile_context>

<pallas_src>
import functools

import jax
import jax.numpy as jnp
from jax.experimental import pallas as pl
from jax.experimental.pallas import tpu as pltpu


def _round_up(x, m):
    return (x + m - 1) // m * m


# --------------------------------------------------------------------------- #
# Fused attention-decoder kernel (entire decode loop in one pallas_call)
# --------------------------------------------------------------------------- #
def _attention_decode_kernel(
    bH_ref,        # (TB, Tp, Dp)   encoder features (f32 or bf16), step-resident
    emb_ref,       # (1, TB, 4Hp)   gathered LSTM embedding rows for this step
    w_i2h_t_ref,   # (Dp, Hp)       i2h.weight^T (padded)
    w_h2h_t_ref,   # (Hp, Hp)       h2h.weight^T
    b_h2h_ref,     # (1, Hp)        h2h.bias
    w_score_ref,   # (1, Hp)        score.weight
    w_ctx_t_ref,   # (Dp, 4Hp)      rnn.weight_ih[:, :D]^T (context part)
    w_hh_t_ref,    # (Hp, 4Hp)      rnn.weight_hh^T
    b_lstm_ref,    # (1, 4Hp)       rnn.bias_ih + rnn.bias_hh
    hid_out_ref,   # (1, TB, Hp)    hidden state output for this step
    proj_sc,       # (TB, Tp, Hp)   VMEM scratch: hoisted i2h projection
    h_sc,          # (TB, Hp)       VMEM scratch: recurrent hidden
    c_sc,          # (TB, Hp)       VMEM scratch: recurrent cell
    *,
    t_real,        # static: number of valid encoder time-steps (<= Tp)
):
    step = pl.program_id(1)

    # ---- step 0: zero recurrent state, hoist loop-invariant i2h projection ----
    @pl.when(step == 0)
    def _init():
        h_sc[...] = jnp.zeros_like(h_sc)
        c_sc[...] = jnp.zeros_like(c_sc)
        bH = bH_ref[...]
        TB, Tp, Dp = bH.shape
        Wi = w_i2h_t_ref[...]
        proj_sc[...] = jnp.dot(
            bH.reshape(TB * Tp, Dp), Wi,
            preferred_element_type=jnp.float32).reshape(TB, Tp, Wi.shape[1])

    h = h_sc[...]                                   # (TB, Hp) f32
    c = c_sc[...]                                   # (TB, Hp) f32
    proj = proj_sc[...]                             # (TB, Tp, Hp) f32
    Hp = h.shape[1]
    Tp = proj.shape[1]
    mxu_dt = w_h2h_t_ref.dtype

    # ---- prev_hidden_proj = h2h(prev_hidden[0]) -------------------------------
    hproj = jnp.dot(h.astype(mxu_dt), w_h2h_t_ref[...],
                    preferred_element_type=jnp.float32) + b_h2h_ref[...]

    # ---- e = score(tanh(proj + hproj)) : width-1 matmul -> VPU mul + reduce ----
    t = jnp.tanh(proj + hproj[:, None, :])          # (TB, Tp, Hp)
    e = jnp.sum(t * w_score_ref[...][None, :, :], axis=-1)          # (TB, Tp)
    if t_real < Tp:                                  # mask padded time-steps
        tid = jax.lax.broadcasted_iota(jnp.int32, e.shape, 1)
        e = jnp.where(tid < t_real, e, -1e30)

    # ---- alpha = softmax over T (EUP exp + approx reciprocal, no VPU divide) --
    m = jnp.max(e, axis=1, keepdims=True)
    p = jnp.exp(e - m)
    alpha = p * pl.reciprocal(jnp.sum(p, axis=1, keepdims=True), approx=True)

    # ---- context = sum_t alpha * batch_H : matvec -> VPU mul + T-reduce -------
    context = jnp.sum(alpha[:, :, None] * bH_ref[...].astype(jnp.float32),
                      axis=1)                                       # (TB, Dp)

    # ---- LSTMCell gates (embedding rows already gathered outside kernel) ------
    gates = (
        jnp.dot(context.astype(mxu_dt), w_ctx_t_ref[...],
                preferred_element_type=jnp.float32)
        + jnp.dot(h.astype(mxu_dt), w_hh_t_ref[...],
                  preferred_element_type=jnp.float32)
        + emb_ref[0]
        + b_lstm_ref[...]
    )                                                               # (TB, 4Hp)

    g_i = jax.nn.sigmoid(gates[:, 0 * Hp:1 * Hp])
    g_f = jax.nn.sigmoid(gates[:, 1 * Hp:2 * Hp])
    g_g = jnp.tanh(gates[:, 2 * Hp:3 * Hp])
    g_o = jax.nn.sigmoid(gates[:, 3 * Hp:4 * Hp])

    c_new = g_f * c + g_i * g_g
    h_new = g_o * jnp.tanh(c_new)

    h_sc[...] = h_new
    c_sc[...] = c_new
    hid_out_ref[0] = h_new


# --------------------------------------------------------------------------- #
# Parameter packing: pad to (8,128) tiles, pre-transpose, fuse biases, build the
# LSTM-input embedding table.  Done ONCE, outside the decode loop.
# --------------------------------------------------------------------------- #
def pack_attention_params(raw, gen_w, gen_b, *, mxu_dtype=jnp.float32, lane=128):
    """raw (PyTorch layout):
      w_i2h (H, D), w_h2h (H, H), b_h2h (H,), w_score (1, H),
      w_ih (4H, D+E), b_ih (4H,), w_hh (4H, H), b_hh (4H,)
    gen_w (C, H), gen_b (C,)
    """
    H, D = raw['w_i2h'].shape
    E = raw['w_ih'].shape[1] - D
    C = gen_w.shape[0]
    Hp, Dp, Cp = _round_up(H, lane), _round_up(D, lane), _round_up(C, lane)

    def pad2(w, r, c):
        return jnp.pad(w, ((0, r - w.shape[0]), (0, c - w.shape[1])))

    def pad_gate_rows(w, cols):
        # (4H, K) -> (4Hp, cols): each PyTorch gate block (i, f, g, o) is
        # zero-padded to Hp rows so the gate slices land on 128-aligned lanes.
        return jnp.concatenate(
            [pad2(w[g * H:(g + 1) * H], Hp, cols) for g in range(4)], axis=0)

    def pad_gate_vec(v):
        return jnp.concatenate(
            [jnp.pad(v[g * H:(g + 1) * H], (0, Hp - H)) for g in range(4)])

    w_ih = raw['w_ih']
    return {
        'w_i2h_t': pad2(raw['w_i2h'], Hp, Dp).T.astype(mxu_dtype),      # (Dp, Hp)
        'w_h2h_t': pad2(raw['w_h2h'], Hp, Hp).T.astype(mxu_dtype),      # (Hp, Hp)
        'b_h2h': jnp.pad(raw['b_h2h'], (0, Hp - H)).reshape(1, Hp),
        'w_score': pad2(raw['w_score'], 1, Hp),                         # (1, Hp)
        'w_ctx_t': pad_gate_rows(w_ih[:, :D], Dp).T.astype(mxu_dtype),  # (Dp, 4Hp)
        'w_hh_t': pad_gate_rows(raw['w_hh'], Hp).T.astype(mxu_dtype),   # (Hp, 4Hp)
        'emb_table': pad_gate_rows(w_ih[:, D:], E).T,                   # (E, 4Hp) f32
        'b_lstm': pad_gate_vec(raw['b_ih'] + raw['b_hh']).reshape(1, 4 * Hp),
        'gen_w_t': pad2(gen_w, Cp, Hp).T,                               # (Hp, Cp)
        'gen_b': jnp.pad(gen_b, (0, Cp - C)).reshape(1, Cp),
    }


# --------------------------------------------------------------------------- #
# Generator (Linear) kernel: tiled over rows and (128-padded) classes
# --------------------------------------------------------------------------- #
def _generator_kernel(x_ref, w_ref, b_ref, o_ref):
    o_ref[...] = (jnp.dot(x_ref[...], w_ref[...],
                          preferred_element_type=jnp.float32)
                  + b_ref[...]).astype(o_ref.dtype)


def generator_linear(x, w_t, b, *, tile_m=256, tile_c=512):
    """x: (M, Hp) @ w_t: (Hp, Cp) + b: (1, Cp) -> (M, Cp), tiled over M and Cp."""
    M, Hp = x.shape
    Cp = w_t.shape[1]
    assert tile_m % 8 == 0 and tile_c % 128 == 0 and Cp % 128 == 0
    Mp = _round_up(M, 8)
    tm = min(tile_m, Mp)
    Mp = _round_up(Mp, tm)
    tc = min(tile_c, Cp)
    while Cp % tc != 0:          # Cp is a multiple of 128, so this terminates
        tc -= 128
    xp = jnp.pad(x, ((0, Mp - M), (0, 0)))
    out = pl.pallas_call(
        _generator_kernel,
        out_shape=jax.ShapeDtypeStruct((Mp, Cp), jnp.float32),
        grid=(Mp // tm, Cp // tc),
        in_specs=[pl.BlockSpec((tm, Hp), lambda i, j: (i, 0)),
                  pl.BlockSpec((Hp, tc), lambda i, j: (0, j)),
                  pl.BlockSpec((1, tc), lambda i, j: (0, j))],
        out_specs=pl.BlockSpec((tm, tc), lambda i, j: (i, j)),
        compiler_params=pltpu.CompilerParams(
            dimension_semantics=("parallel", "parallel")),
    )(xp, w_t, b)
    return out[:M]


# --------------------------------------------------------------------------- #
# Attention.forward (training path)
# --------------------------------------------------------------------------- #
def attention_forward_train(batch_H, text, params, *, num_classes,
                            batch_max_length=25, block_b=None, vmem_limit_mb=64):
    """batch_H: (B, T, D) f32; text: (B, max_len+1) int32 -> probs (B, S, C)."""
    B, T, D = batch_H.shape
    num_steps = batch_max_length + 1

    Dp, Hp = params['w_i2h_t'].shape
    G = params['b_lstm'].shape[1]             # 4 * Hp
    Cp = params['gen_b'].shape[1]
    mxu_dtype = params['w_i2h_t'].dtype
    # Sublane tile is 8 (f32) / 16 (bf16): pad T to 16 so the in-kernel
    # (TB, Tp, Dp) -> (TB*Tp, Dp) reshape is a free relayout for both.
    Tp = _round_up(T, 16)

    # Pad + (optionally bf16-)cast the encoder features ONCE.
    bH = jnp.pad(batch_H, ((0, 0), (0, Tp - T), (0, Dp - D))).astype(mxu_dtype)

    # One-hot @ W_ih[:, D:] == embedding-row gather; do it once for all steps.
    ids = text[:, :num_steps]                                      # (B, S)
    emb_all = jnp.take(params['emb_table'], ids, axis=0)           # (B, S, 4Hp)
    emb_all = jnp.transpose(emb_all, (1, 0, 2))                    # (S, B, 4Hp)

    # Batch tiling: TB=B keeps one resident block; pass block_b=B//2 (multiple
    # of 8) on v7x so both TensorCores each get a "parallel" batch block.
    TB = B if block_b is None else block_b
    assert B % TB == 0 and (TB == B or TB % 8 == 0), \
        "block_b must divide B and be a multiple of 8"

    def const2(arr):   # weight blocks: constant index -> loaded once, resident
        return pl.BlockSpec(arr.shape, lambda b, s: (0, 0))

    hid = pl.pallas_call(
        functools.partial(_attention_decode_kernel, t_real=T),
        out_shape=jax.ShapeDtypeStruct((num_steps, B, Hp), jnp.float32),
        grid=(B // TB, num_steps),
        in_specs=[
            pl.BlockSpec((TB, Tp, Dp), lambda b, s: (b, 0, 0)),    # batch_H
            pl.BlockSpec((1, TB, G), lambda b, s: (s, b, 0)),      # per-step emb
            const2(params['w_i2h_t']),
            const2(params['w_h2h_t']),
            const2(params['b_h2h']),
            const2(params['w_score']),
            const2(params['w_ctx_t']),
            const2(params['w_hh_t']),
            const2(params['b_lstm']),
        ],
        out_specs=pl.BlockSpec((1, TB, Hp), lambda b, s: (s, b, 0)),
        scratch_shapes=[
            pltpu.VMEM((TB, Tp, Hp), jnp.float32),   # hoisted i2h projection
            pltpu.VMEM((TB, Hp), jnp.float32),       # h carry
            pltpu.VMEM((TB, Hp), jnp.float32),       # c carry
        ],
        compiler_params=pltpu.CompilerParams(
            dimension_semantics=("parallel", "arbitrary"),
            vmem_limit_bytes=vmem_limit_mb * 1024 * 1024),
    )(bH, emb_all, params['w_i2h_t'], params['w_h2h_t'], params['b_h2h'],
      params['w_score'], params['w_ctx_t'], params['w_hh_t'], params['b_lstm'])

    # Generator over all hidden states, then un-pad classes.
    probs = generator_linear(hid.reshape(num_steps * B, Hp),
                             params['gen_w_t'], params['gen_b'])   # (S*B, Cp)
    probs = probs.reshape(num_steps, B, Cp).transpose(1, 0, 2)[:, :, :num_classes]
    return probs


# --------------------------------------------------------------------------- #
# Pure-JAX references mirroring the PyTorch module
# --------------------------------------------------------------------------- #
def _reference_cell(batch_H, h_prev, c_prev, char_onehots, raw):
    H = raw['w_h2h'].shape[0]
    proj = jnp.einsum('btd,hd->bth', batch_H, raw['w_i2h'])
    hproj = h_prev @ raw['w_h2h'].T + raw['b_h2h']
    e = jnp.einsum('bth,kh->btk', jnp.tanh(proj + hproj[:, None, :]),
                   raw['w_score'])
    alpha = jax.nn.softmax(e, axis=1)
    context = jnp.einsum('btk,btd->bd', alpha, batch_H)
    x = jnp.concatenate([context, char_onehots], axis=1)
    gates = x @ raw['w_ih'].T + h_prev @ raw['w_hh'].T + raw['b_ih'] + raw['b_hh']
    i = jax.nn.sigmoid(gates[:, 0 * H:1 * H])
    f = jax.nn.sigmoid(gates[:, 1 * H:2 * H])
    g = jnp.tanh(gates[:, 2 * H:3 * H])
    o = jax.nn.sigmoid(gates[:, 3 * H:4 * H])
    c_new = f * c_prev + i * g
    h_new = o * jnp.tanh(c_new)
    return (h_new, c_new), alpha


def _reference_attention(batch_H, text, raw, gen_w, gen_b, batch_max_length,
                         num_embeddings=64):
    B = batch_H.shape[0]
    H = raw['w_h2h'].shape[0]
    num_steps = batch_max_length + 1
    h = jnp.zeros((B, H), jnp.float32)
    c = jnp.zeros((B, H), jnp.float32)
    hs = []
    for i in range(num_steps):
        oh = jax.nn.one_hot(text[:, i], num_embeddings, dtype=jnp.float32)
        (h, c), _ = _reference_cell(batch_H, h, c, oh, raw)
        hs.append(h)
    hidden = jnp.stack(hs, axis=1)
    return hidden @ gen_w.T + gen_b


# --------------------------------------------------------------------------- #
if __name__ == "__main__":
    B, T = 2, 10         # batch, encoder time-steps (exercises T padding)
    D = 32               # input_size (contextual feature channels)
    H = 32               # hidden_size
    E = 64               # num_embeddings (hard-coded to 64 in the module)
    C = 38               # num_classes
    max_len = 4          # -> 5 decode steps

    key = jax.random.PRNGKey(0)
    ks = jax.random.split(key, 16)

    def init(k, shape, scale=0.1):
        return (scale * jax.random.normal(k, shape)).astype(jnp.float32)

    raw = {
        'w_i2h':  init(ks[0], (H, D)),           # i2h.weight (bias=False)
        'w_h2h':  init(ks[1], (H, H)),           # h2h.weight
        'b_h2h':  init(ks[2], (H,)),             # h2h.bias
        'w_score': init(ks[3], (1, H)),          # score.weight (bias=False)
        'w_ih':   init(ks[4], (4 * H, D + E)),   # rnn.weight_ih
        'b_ih':   init(ks[5], (4 * H,)),         # rnn.bias_ih
        'w_hh':   init(ks[6], (4 * H, H)),       # rnn.weight_hh
        'b_hh':   init(ks[7], (4 * H,)),         # rnn.bias_hh
    }
    gen_w = init(ks[8], (C, H))                  # generator.weight
    gen_b = init(ks[9], (C,))                    # generator.bias

    batch_H = init(ks[10], (B, T, D), scale=1.0)
    text = jax.random.randint(ks[11], (B, max_len + 1), 0, E)

    probs_ref = _reference_attention(batch_H, text, raw, gen_w, gen_b,
                                     max_len, num_embeddings=E)

    fwd = jax.jit(functools.partial(attention_forward_train,
                                    num_classes=C, batch_max_length=max_len))

    # ---- 1) f32 MXU path ------------------------------------------------------
    params_f32 = pack_attention_params(raw, gen_w, gen_b, mxu_dtype=jnp.float32)
    probs = fwd(batch_H, text, params_f32)
    jax.block_until_ready(probs)
    assert probs.shape == (B, max_len + 1, C)
    # approx-reciprocal softmax -> slightly relaxed tolerance vs exact reference
    assert jnp.allclose(probs, probs_ref, atol=5e-3), "probs mismatch (f32)"

    # ---- 2) bf16 MXU operands (v6e/v7x fast path), f32 accumulation -----------
    params_bf16 = pack_attention_params(raw, gen_w, gen_b, mxu_dtype=jnp.bfloat16)
    probs_bf = fwd(batch_H, text, params_bf16)
    jax.block_until_ready(probs_bf)
    assert probs_bf.shape == (B, max_len + 1, C)
    assert jnp.allclose(probs_bf, probs_ref, atol=5e-2), "probs mismatch (bf16)"

    print("KERNEL_OK")
</pallas_src>

<mosaic_0001>
module attributes {stable_mosaic.version = 11 : i64} {
  func.func @_generator_kernel(%arg0: i32, %arg1: i32, %arg2: memref<16x128xf32, #tpu.memory_space<vmem>>, %arg3: memref<128x128xf32, #tpu.memory_space<vmem>>, %arg4: memref<1x128xf32, #tpu.memory_space<vmem>>, %arg5: memref<16x128xf32, #tpu.memory_space<vmem>>) attributes {dimension_semantics = [#tpu.dimension_semantics<parallel>, #tpu.dimension_semantics<parallel>], iteration_bounds = array<i64: 1, 1>, scalar_prefetch = 0 : i64, scratch_operands = 0 : i64, tpu.core_type = #tpu.core_type<tc>, window_params = [{transform_indices = @transform_0, window_bounds = array<i64: 16, 128>}, {transform_indices = @transform_1, window_bounds = array<i64: 128, 128>}, {transform_indices = @transform_2, window_bounds = array<i64: 1, 128>}, {transform_indices = @transform_3, window_bounds = array<i64: 16, 128>}]} {
    %c0 = arith.constant 0 : index
    %c0_0 = arith.constant 0 : index
    %0 = vector.load %arg2[%c0, %c0_0] : memref<16x128xf32, #tpu.memory_space<vmem>>, vector<16x128xf32>
    %c0_1 = arith.constant 0 : index
    %c0_2 = arith.constant 0 : index
    %1 = vector.load %arg3[%c0_1, %c0_2] : memref<128x128xf32, #tpu.memory_space<vmem>>, vector<128x128xf32>
    %cst = arith.constant dense<0.000000e+00> : vector<16x128xf32>
    %2 = tpu.matmul %0, %1, %cst {dimension_numbers = #tpu.dot_dimension_numbers<[1], [0], [0], [1], [0, 0, 1, 1], [], []>} : vector<16x128xf32>, vector<128x128xf32>, vector<16x128xf32> -> vector<16x128xf32>
    %c0_3 = arith.constant 0 : index
    %c0_4 = arith.constant 0 : index
    %3 = vector.load %arg4[%c0_3, %c0_4] : memref<1x128xf32, #tpu.memory_space<vmem>>, vector<1x128xf32>
    %4 = vector.broadcast %3 : vector<1x128xf32> to vector<16x128xf32>
    %5 = arith.addf %2, %4 : vector<16x128xf32>
    %c0_5 = arith.constant 0 : index
    %c0_6 = arith.constant 0 : index
    %6 = vector.load %arg5[%c0_5, %c0_6] : memref<16x128xf32, #tpu.memory_space<vmem>>, vector<16x128xf32>
    tpu.vector_store %arg5[%c0_5, %c0_6], %5 {strides = array<i32>} : memref<16x128xf32, #tpu.memory_space<vmem>>, vector<16x128xf32>,
    return
  }
  func.func @transform_0(%arg0: i32, %arg1: i32) -> (i32, i32) {
    %c0_i32 = arith.constant 0 : i32
    %c0_i32_0 = arith.constant 0 : i32
    return %arg0, %c0_i32 : i32, i32
  }
  func.func @transform_1(%arg0: i32, %arg1: i32) -> (i32, i32) {
    %c0_i32 = arith.constant 0 : i32
    %c0_i32_0 = arith.constant 0 : i32
    return %c0_i32, %arg1 : i32, i32
  }
  func.func @transform_2(%arg0: i32, %arg1: i32) -> (i32, i32) {
    %c0_i32 = arith.constant 0 : i32
    %c0_i32_0 = arith.constant 0 : i32
    return %c0_i32, %arg1 : i32, i32
  }
  func.func @transform_3(%arg0: i32, %arg1: i32) -> (i32, i32) {
    %c0_i32 = arith.constant 0 : i32
    return %arg0, %arg1 : i32, i32
  }
}

module attributes {stable_mosaic.version = 11 : i64} {
  func.func @_attention_decode_kernel(%arg0: i32, %arg1: i32, %arg2: memref<2x16x128xf32, #tpu.memory_space<vmem>>, %arg3: memref<1x2x512xf32, #tpu.memory_space<vmem>>, %arg4: memref<128x128xf32, #tpu.memory_space<vmem>>, %arg5: memref<128x128xf32, #tpu.memory_space<vmem>>, %arg6: memref<1x128xf32, #tpu.memory_space<vmem>>, %arg7: memref<1x128xf32, #tpu.memory_space<vmem>>, %arg8: memref<128x512xf32, #tpu.memory_space<vmem>>, %arg9: memref<128x512xf32, #tpu.memory_space<vmem>>, %arg10: memref<1x512xf32, #tpu.memory_space<vmem>>, %arg11: memref<1x2x128xf32, #tpu.memory_space<vmem>>, %arg12: memref<2x16x128xf32, #tpu.memory_space<vmem>>, %arg13: memref<2x128xf32, #tpu.memory_space<vmem>>, %arg14: memref<2x128xf32, #tpu.memory_space<vmem>>) attributes {dimension_semantics = [#tpu.dimension_semantics<parallel>, #tpu.dimension_semantics<arbitrary>], iteration_bounds = array<i64: 1, 5>, scalar_prefetch = 0 : i64, scratch_operands = 3 : i64, tpu.core_type = #tpu.core_type<tc>, window_params = [{transform_indices = @transform_0, window_bounds = array<i64: 2, 16, 128>}, {transform_indices = @transform_1, window_bounds = array<i64: 1, 2, 512>}, {pipeline_mode = #tpu.pipeline_mode<synchronous>, transform_indices = @transform_2, window_bounds = array<i64: 128, 128>}, {pipeline_mode = #tpu.pipeline_mode<synchronous>, transform_indices = @transform_3, window_bounds = array<i64: 128, 128>}, {pipeline_mode = #tpu.pipeline_mode<synchronous>, transform_indices = @transform_4, window_bounds = array<i64: 1, 128>}, {pipeline_mode = #tpu.pipeline_mode<synchronous>, transform_indices = @transform_5, window_bounds = array<i64: 1, 128>}, {pipeline_mode = #tpu.pipeline_mode<synchronous>, transform_indices = @transform_6, window_bounds = array<i64: 128, 512>}, {pipeline_mode = #tpu.pipeline_mode<synchronous>, transform_indices = @transform_7, window_bounds = array<i64: 128, 512>}, {pipeline_mode = #tpu.pipeline_mode<synchronous>, transform_indices = @transform_8, window_bounds = array<i64: 1, 512>}, {transform_indices = @transform_9, window_bounds = array<i64: 1, 2, 128>}]} {
    %c0_i32 = arith.constant 0 : i32
    %0 = arith.cmpi eq, %arg1, %c0_i32 : i32
    %1 = arith.extui %0 : i1 to i32
    %c0_i32_0 = arith.constant 0 : i32
    %2 = arith.cmpi ne, %1, %c0_i32_0 : i32
    scf.if %2 {
      %cst_42 = arith.constant 0.000000e+00 : f32
      %81 = vector.broadcast %cst_42 : f32 to vector<2x128xf32>
      %c0_43 = arith.constant 0 : index
      %c0_44 = arith.constant 0 : index
      %82 = vector.load %arg13[%c0_43, %c0_44] : memref<2x128xf32, #tpu.memory_space<vmem>>, vector<2x128xf32>
      tpu.vector_store %arg13[%c0_43, %c0_44], %81 {strides = array<i32>} : memref<2x128xf32, #tpu.memory_space<vmem>>, vector<2x128xf32>,
      %cst_45 = arith.constant 0.000000e+00 : f32
      %83 = vector.broadcast %cst_45 : f32 to vector<2x128xf32>
      %c0_46 = arith.constant 0 : index
      %c0_47 = arith.constant 0 : index
      %84 = vector.load %arg14[%c0_46, %c0_47] : memref<2x128xf32, #tpu.memory_space<vmem>>, vector<2x128xf32>
      tpu.vector_store %arg14[%c0_46, %c0_47], %83 {strides = array<i32>} : memref<2x128xf32, #tpu.memory_space<vmem>>, vector<2x128xf32>,
      %c0_48 = arith.constant 0 : index
      %c0_49 = arith.constant 0 : index
      %c0_50 = arith.constant 0 : index
      %85 = vector.load %arg2[%c0_48, %c0_49, %c0_50] : memref<2x16x128xf32, #tpu.memory_space<vmem>>, vector<2x16x128xf32>
      %c0_51 = arith.constant 0 : index
      %c0_52 = arith.constant 0 : index
      %86 = vector.load %arg4[%c0_51, %c0_52] : memref<128x128xf32, #tpu.memory_space<vmem>>, vector<128x128xf32>
      %87 = vector.shape_cast %85 : vector<2x16x128xf32> to vector<32x128xf32>
      %cst_53 = arith.constant dense<0.000000e+00> : vector<32x128xf32>
      %88 = tpu.matmul %87, %86, %cst_53 {dimension_numbers = #tpu.dot_dimension_numbers<[1], [0], [0], [1], [0, 0, 1, 1], [], []>} : vector<32x128xf32>, vector<128x128xf32>, vector<32x128xf32> -> vector<32x128xf32>
      %89 = vector.shape_cast %88 : vector<32x128xf32> to vector<2x16x128xf32>
      %c0_54 = arith.constant 0 : index
      %c0_55 = arith.constant 0 : index
      %c0_56 = arith.constant 0 : index
      %90 = vector.load %arg12[%c0_54, %c0_55, %c0_56] : memref<2x16x128xf32, #tpu.memory_space<vmem>>, vector<2x16x128xf32>
      tpu.vector_store %arg12[%c0_54, %c0_55, %c0_56], %89 {strides = array<i32>} : memref<2x16x128xf32, #tpu.memory_space<vmem>>, vector<2x16x128xf32>,
    } else {
    }
    %c0 = arith.constant 0 : index
    %c0_1 = arith.constant 0 : index
    %3 = vector.load %arg13[%c0, %c0_1] : memref<2x128xf32, #tpu.memory_space<vmem>>, vector<2x128xf32>
    %c0_2 = arith.constant 0 : index
    %c0_3 = arith.constant 0 : index
    %4 = vector.load %arg14[%c0_2, %c0_3] : memref<2x128xf32, #tpu.memory_space<vmem>>, vector<2x128xf32>
    %c0_4 = arith.constant 0 : index
    %c0_5 = arith.constant 0 : index
    %c0_6 = arith.constant 0 : index
    %5 = vector.load %arg12[%c0_4, %c0_5, %c0_6] : memref<2x16x128xf32, #tpu.memory_space<vmem>>, vector<2x16x128xf32>
    %c0_7 = arith.constant 0 : index
    %c0_8 = arith.constant 0 : index
    %6 = vector.load %arg5[%c0_7, %c0_8] : memref<128x128xf32, #tpu.memory_space<vmem>>, vector<128x128xf32>
    %cst = arith.constant dense<0.000000e+00> : vector<2x128xf32>
    %7 = tpu.matmul %3, %6, %cst {dimension_numbers = #tpu.dot_dimension_numbers<[1], [0], [0], [1], [0, 0, 1, 1], [], []>} : vector<2x128xf32>, vector<128x128xf32>, vector<2x128xf32> -> vector<2x128xf32>
    %c0_9 = arith.constant 0 : index
    %c0_10 = arith.constant 0 : index
    %8 = vector.load %arg6[%c0_9, %c0_10] : memref<1x128xf32, #tpu.memory_space<vmem>>, vector<1x128xf32>
    %9 = vector.broadcast %8 : vector<1x128xf32> to vector<2x128xf32>
    %10 = arith.addf %7, %9 : vector<2x128xf32>
    %11 = vector.shape_cast %10 : vector<2x128xf32> to vector<2x1x128xf32>
    %12 = vector.broadcast %11 : vector<2x1x128xf32> to vector<2x16x128xf32>
    %13 = arith.addf %5, %12 : vector<2x16x128xf32>
    %14 = math.tanh %13 : vector<2x16x128xf32>
    %c0_11 = arith.constant 0 : index
    %c0_12 = arith.constant 0 : index
    %15 = vector.load %arg7[%c0_11, %c0_12] : memref<1x128xf32, #tpu.memory_space<vmem>>, vector<1x128xf32>
    %16 = vector.shape_cast %15 : vector<1x128xf32> to vector<1x1x128xf32>
    %17 = vector.broadcast %16 : vector<1x1x128xf32> to vector<2x16x128xf32>
    %18 = arith.mulf %14, %17 : vector<2x16x128xf32>
    %cst_13 = arith.constant dense<0.000000e+00> : vector<2x16xf32>
    %19 = vector.multi_reduction <add>, %18, %cst_13 [2] : vector<2x16x128xf32> to vector<2x16xf32>
    %20 = tpu.iota {dimensions = array<i32: 1>} : vector<2x16xi32>
    %c10_i32 = arith.constant 10 : i32
    %21 = vector.broadcast %c10_i32 : i32 to vector<2x16xi32>
    %22 = arith.cmpi slt, %20, %21 : vector<2x16xi32>
    %cst_14 = arith.constant -1.000000e+30 : f32
    %23 = vector.broadcast %cst_14 : f32 to vector<2x16xf32>
    %24 = arith.select %22, %19, %23 : vector<2x16xi1>, vector<2x16xf32>
    %cst_15 = arith.constant dense<0xFF800000> : vector<2xf32>
    %25 = vector.multi_reduction <maximumf>, %24, %cst_15 [1] : vector<2x16xf32> to vector<2xf32>
    %26 = vector.shape_cast %25 : vector<2xf32> to vector<2x1xf32>
    %27 = vector.broadcast %26 : vector<2x1xf32> to vector<2x16xf32>
    %28 = arith.subf %24, %27 : vector<2x16xf32>
    %29 = math.exp %28 : vector<2x16xf32>
    %cst_16 = arith.constant dense<0.000000e+00> : vector<2xf32>
    %30 = vector.multi_reduction <add>, %29, %cst_16 [1] : vector<2x16xf32> to vector<2xf32>
    %31 = vector.shape_cast %30 : vector<2xf32> to vector<2x1xf32>
    %32 = tpu.reciprocal %31 {approx = true} : vector<2x1xf32> -> vector<2x1xf32>
    %33 = vector.broadcast %32 : vector<2x1xf32> to vector<2x16xf32>
    %34 = arith.mulf %29, %33 : vector<2x16xf32>
    %35 = vector.shape_cast %34 : vector<2x16xf32> to vector<2x16x1xf32>
    %c0_17 = arith.constant 0 : index
    %c0_18 = arith.constant 0 : index
    %c0_19 = arith.constant 0 : index
    %36 = vector.load %arg2[%c0_17, %c0_18, %c0_19] : memref<2x16x128xf32, #tpu.memory_space<vmem>>, vector<2x16x128xf32>
    %37 = vector.broadcast %35 : vector<2x16x1xf32> to vector<2x16x128xf32>
    %38 = arith.mulf %37, %36 : vector<2x16x128xf32>
    %cst_20 = arith.constant dense<0.000000e+00> : vector<2x128xf32>
    %39 = vector.multi_reduction <add>, %38, %cst_20 [1] : vector<2x16x128xf32> to vector<2x128xf32>
    %c0_21 = arith.constant 0 : index
    %c0_22 = arith.constant 0 : index
    %40 = vector.load %arg8[%c0_21, %c0_22] : memref<128x512xf32, #tpu.memory_space<vmem>>, vector<128x512xf32>
    %cst_23 = arith.constant dense<0.000000e+00> : vector<2x512xf32>
    %41 = tpu.matmul %39, %40, %cst_23 {dimension_numbers = #tpu.dot_dimension_numbers<[1], [0], [0], [1], [0, 0, 1, 1], [], []>} : vector<2x128xf32>, vector<128x512xf32>, vector<2x512xf32> -> vector<2x512xf32>
    %c0_24 = arith.constant 0 : index
    %c0_25 = arith.constant 0 : index
    %42 = vector.load %arg9[%c0_24, %c0_25] : memref<128x512xf32, #tpu.memory_space<vmem>>, vector<128x512xf32>
    %cst_26 = arith.constant dense<0.000000e+00> : vector<2x512xf32>
    %43 = tpu.matmul %3, %42, %cst_26 {dimension_numbers = #tpu.dot_dimension_numbers<[1], [0], [0], [1], [0, 0, 1, 1], [], []>} : vector<2x128xf32>, vector<128x512xf32>, vector<2x512xf32> -> vector<2x512xf32>
    %44 = arith.addf %41, %43 : vector<2x512xf32>
    %c0_27 = arith.constant 0 : index
    %c0_28 = arith.constant 0 : index
    %c0_29 = arith.constant 0 : index
    %45 = vector.load %arg3[%c0_27, %c0_28, %c0_29] : memref<1x2x512xf32, #tpu.memory_space<vmem>>, vector<1x2x512xf32>
    %46 = vector.shape_cast %45 : vector<1x2x512xf32> to vector<2x512xf32>
    %47 = arith.addf %44, %46 : vector<2x512xf32>
    %c0_30 = arith.constant 0 : index
    %c0_31 = arith.constant 0 : index
    %48 = vector.load %arg10[%c0_30, %c0_31] : memref<1x512xf32, #tpu.memory_space<vmem>>, vector<1x512xf32>
    %49 = vector.broadcast %48 : vector<1x512xf32> to vector<2x512xf32>
    %50 = arith.addf %47, %49 : vector<2x512xf32>
    %51 = vector.extract_strided_slice %50 {offsets = [0, 0], sizes = [2, 128], strides = [1, 1]} : vector<2x512xf32> to vector<2x128xf32>
    %52 = arith.negf %51 : vector<2x128xf32>
    %53 = math.exp %52 : vector<2x128xf32>
    %cst_32 = arith.constant 1.000000e+00 : f32
    %54 = vector.broadcast %cst_32 : f32 to vector<2x128xf32>
    %55 = arith.addf %54, %53 : vector<2x128xf32>
    %56 = arith.divf %54, %55 : vector<2x128xf32>
    %57 = vector.extract_strided_slice %50 {offsets = [0, 128], sizes = [2, 128], strides = [1, 1]} : vector<2x512xf32> to vector<2x128xf32>
    %58 = arith.negf %57 : vector<2x128xf32>
    %59 = math.exp %58 : vector<2x128xf32>
    %cst_33 = arith.constant 1.000000e+00 : f32
    %60 = vector.broadcast %cst_33 : f32 to vector<2x128xf32>
    %61 = arith.addf %60, %59 : vector<2x128xf32>
    %62 = arith.divf %60, %61 : vector<2x128xf32>
    %63 = vector.extract_strided_slice %50 {offsets = [0, 256], sizes = [2, 128], strides = [1, 1]} : vector<2x512xf32> to vector<2x128xf32>
    %64 = math.tanh %63 : vector<2x128xf32>
    %65 = vector.extract_strided_slice %50 {offsets = [0, 384], sizes = [2, 128], strides = [1, 1]} : vector<2x512xf32> to vector<2x128xf32>
    %66 = arith.negf %65 : vector<2x128xf32>
    %67 = math.exp %66 : vector<2x128xf32>
    %cst_34 = arith.constant 1.000000e+00 : f32
    %68 = vector.broadcast %cst_34 : f32 to vector<2x128xf32>
    %69 = arith.addf %68, %67 : vector<2x128xf32>
    %70 = arith.divf %68, %69 : vector<2x128xf32>
    %71 = arith.mulf %62, %4 : vector<2x128xf32>
    %72 = arith.mulf %56, %64 : vector<2x128xf32>
    %73 = arith.addf %71, %72 : vector<2x128xf32>
    %74 = math.tanh %73 : vector<2x128xf32>
    %75 = arith.mulf %70, %74 : vector<2x128xf32>
    %c0_35 = arith.constant 0 : index
    %c0_36 = arith.constant 0 : index
    %76 = vector.load %arg13[%c0_35, %c0_36] : memref<2x128xf32, #tpu.memory_space<vmem>>, vector<2x128xf32>
    tpu.vector_store %arg13[%c0_35, %c0_36], %75 {strides = array<i32>} : memref<2x128xf32, #tpu.memory_space<vmem>>, vector<2x128xf32>,
    %c0_37 = arith.constant 0 : index
    %c0_38 = arith.constant 0 : index
    %77 = vector.load %arg14[%c0_37, %c0_38] : memref<2x128xf32, #tpu.memory_space<vmem>>, vector<2x128xf32>
    tpu.vector_store %arg14[%c0_37, %c0_38], %73 {strides = array<i32>} : memref<2x128xf32, #tpu.memory_space<vmem>>, vector<2x128xf32>,
    %c0_39 = arith.constant 0 : index
    %c0_40 = arith.constant 0 : index
    %c0_41 = arith.constant 0 : index
    %78 = vector.load %arg11[%c0_39, %c0_40, %c0_41] : memref<1x2x128xf32, #tpu.memory_space<vmem>>, vector<1x2x128xf32>
    %79 = vector.shape_cast %78 : vector<1x2x128xf32> to vector<2x128xf32>
    %80 = vector.shape_cast %75 : vector<2x128xf32> to vector<1x2x128xf32>
    tpu.vector_store %arg11[%c0_39, %c0_40, %c0_41], %80 {strides = array<i32>} : memref<1x2x128xf32, #tpu.memory_space<vmem>>, vector<1x2x128xf32>,
    return
  }
  func.func @transform_0(%arg0: i32, %arg1: i32) -> (i32, i32, i32) {
    %c0_i32 = arith.constant 0 : i32
    %c0_i32_0 = arith.constant 0 : i32
    %c0_i32_1 = arith.constant 0 : i32
    return %arg0, %c0_i32, %c0_i32_0 : i32, i32, i32
  }
  func.func @transform_1(%arg0: i32, %arg1: i32) -> (i32, i32, i32) {
    %c0_i32 = arith.constant 0 : i32
    %c0_i32_0 = arith.constant 0 : i32
    return %arg1, %arg0, %c0_i32 : i32, i32, i32
  }
  func.func @transform_2(%arg0: i32, %arg1: i32) -> (i32, i32) {
    %c0_i32 = arith.constant 0 : i32
    %c0_i32_0 = arith.constant 0 : i32
    %c0_i32_1 = arith.constant 0 : i32
    return %c0_i32, %c0_i32_0 : i32, i32
  }
  func.func @transform_3(%arg0: i32, %arg1: i32) -> (i32, i32) {
    %c0_i32 = arith.constant 0 : i32
    %c0_i32_0 = arith.constant 0 : i32
    %c0_i32_1 = arith.constant 0 : i32
    return %c0_i32, %c0_i32_0 : i32, i32
  }
  func.func @transform_4(%arg0: i32, %arg1: i32) -> (i32, i32) {
    %c0_i32 = arith.constant 0 : i32
    %c0_i32_0 = arith.constant 0 : i32
    %c0_i32_1 = arith.constant 0 : i32
    return %c0_i32, %c0_i32_0 : i32, i32
  }
  func.func @transform_5(%arg0: i32, %arg1: i32) -> (i32, i32) {
    %c0_i32 = arith.constant 0 : i32
    %c0_i32_0 = arith.constant 0 : i32
    %c0_i32_1 = arith.constant 0 : i32
    return %c0_i32, %c0_i32_0 : i32, i32
  }
  func.func @transform_6(%arg0: i32, %arg1: i32) -> (i32, i32) {
    %c0_i32 = arith.constant 0 : i32
    %c0_i32_0 = arith.constant 0 : i32
    %c0_i32_1 = arith.constant 0 : i32
    return %c0_i32, %c0_i32_0 : i32, i32
  }
  func.func @transform_7(%arg0: i32, %arg1: i32) -> (i32, i32) {
    %c0_i32 = arith.constant 0 : i32
    %c0_i32_0 = arith.constant 0 : i32
    %c0_i32_1 = arith.constant 0 : i32
    return %c0_i32, %c0_i32_0 : i32, i32
  }
  func.func @transform_8(%arg0: i32, %arg1: i32) -> (i32, i32) {
    %c0_i32 = arith.constant 0 : i32
    %c0_i32_0 = arith.constant 0 : i32
    %c0_i32_1 = arith.constant 0 : i32
    return %c0_i32, %c0_i32_0 : i32, i32
  }
  func.func @transform_9(%arg0: i32, %arg1: i32) -> (i32, i32, i32) {
    %c0_i32 = arith.constant 0 : i32
    %c0_i32_0 = arith.constant 0 : i32
    return %arg1, %arg0, %c0_i32 : i32, i32, i32
  }
}

</mosaic_0001>

<bundles_post_ra>
// kernel: attention_forward_train.3
= control target key start
LH: loop header
LB: loop body
LE: loop exit
PB: predicated region body
PF: predicated region fallthrough
CT: control target
= control target key end

     0   :  { %8 = vsyncpa [#allocation3], 0  ;;  %s248_s12 = smov [#allocation2]   ;;  %s298_s0 = inlined_call_operand.vmem [shape: f32[16,128], index: 0, kind: input, shape index: {}]   ;;  %s299_s1 = inlined_call_operand.hbm [shape: f32[128,128], index: 1, kind: input, shape index: {}]   ;;  %s300_s2 = inlined_call_operand.vmem [shape: f32[1,128], index: 2, kind: input, shape index: {}]   ;;  %s301_s3 = inlined_call_operand.vmem [shape: f32[16,128], index: 3, kind: output, shape index: {}]  }
   0x1   :  { %s16_s13 = sshll.u32 %s248_s12, 4  ;;  %s224_s16 = scalar_lea.hbm %s299_s1, 2048  ;;  %s17_s13 = int_to_ptr.vmem [resolvable:$true] %s16_s13 }
   0x2   :  { %p225_p0 = scmp.ne.s32.totalorder %s299_s1, %s224_s16  ;;  %p228_p1 = scmp.lt.u32.totalorder %s224_s16, %s299_s1 }
   0x4   :  { %p230_p2 = pnand %p228_p1, %p225_p0 }
   0x6   :  { %233 = shalt.err (!%p230_p2)
}
   0x7   :  { %s234_s21 = scalar_lea.vmem %s17_s13, 2048  ;;  %p239_p4 = scmp.lt.s32.totalorder %s17_s13, %s17_s13 }
   0x8   :  { %p235_p3 = scmp.ne.s32.totalorder %s17_s13, %s234_s21  ;;  %p240_p5 = scmp.lt.s32.totalorder %s234_s21, %s234_s21 }
   0xa   :  { %p241_p6 = por %p240_p5, %p239_p4 }
   0xc   :  { %p242_p7 = pnand %p241_p6, %p235_p3 }
   0xe   :  { %245 = shalt.err (!%p242_p7)
}
   0xf   :  { %s249_s22 = smov 128   ;;  %s250_s23 = smov 8  }
  0x10   :  { %22 = dma.hbm_to_vmem [thread:$0]  %s299_s1, 2048, %s17_s13, [#allocation3], %s249_s22, %s249_s22, %s250_s23  }
  0x11   :  { %246 = dma.done.wait [#allocation3], 2048  }
  0x12   :  { %247 = vsyncadd [#allocation3], 4294965248  ;;  %v30_v0 = vld [vmem:[#allocation2] sm:$0xff]  ;;  %v31_v1 = vld [vmem:[#allocation2 + $0x8] sm:$0xff] }
  0x13   :  { %v32_v2 = vld [vmem:[#allocation2 + $0x10] sm:$0xff]  ;;  %v189_v3 = vpack.c.bf16 %v31_v1, %v30_v0  ;;  %v33_v4 = vld [vmem:[#allocation2 + $0x18] sm:$0xff]  ;;  %v34_v6 = vld [vmem:[#allocation2 + $0x20] sm:$0xff] }
  0x14   :  { %v193_v5 = vpack.c.bf16 %v33_v4, %v32_v2  ;;  %v35_v7 = vld [vmem:[#allocation2 + $0x28] sm:$0xff]  ;;  %v28_v9 = vld [vmem:[%s298_s0] sm:$0xff]  ;;  %v36_v10 = vld [vmem:[#allocation2 + $0x30] sm:$0xff] }
  0x15   :  { %190 = vmatprep.subr.bf16.mxu0 %v189_v3  ;;  %v197_v8 = vpack.c.bf16 %v35_v7, %v34_v6  ;;  %v37_v11 = vld [vmem:[#allocation2 + $0x38] sm:$0xff]  ;;  %186 = vmatprep.mubr.f32.mxu0 %v28_v9  ;;  %v38_v13 = vld [vmem:[#allocation2 + $0x40] sm:$0xff]  ;;  %v39_v14 = vld [vmem:[#allocation2 + $0x48] sm:$0xff] }
  0x16   :  { %192 = vmatpush3.bf16.msra.mxu0 %v189_v3  ;;  %v201_v12 = vpack.c.bf16 %v37_v11, %v36_v10  ;;  %v205_v15 = vpack.c.bf16 %v39_v14, %v38_v13  ;;  %v40_v16 = vld [vmem:[#allocation2 + $0x50] sm:$0xff]  ;;  %v41_v17 = vld [vmem:[#allocation2 + $0x58] sm:$0xff]  ;;  %v42_v19 = vld [vmem:[#allocation2 + $0x60] sm:$0xff] }
  0x17   :  { %194 = vmatprep.subr.bf16.mxu0 %v193_v5  ;;  %v209_v18 = vpack.c.bf16 %v41_v17, %v40_v16  ;;  %v43_v20 = vld [vmem:[#allocation2 + $0x68] sm:$0xff]  ;;  %v44_v22 = vld [vmem:[#allocation2 + $0x70] sm:$0xff]  ;;  %v45_v23 = vld [vmem:[#allocation2 + $0x78] sm:$0xff] }
  0x18   :  { %v213_v21 = vpack.c.bf16 %v43_v20, %v42_v19  ;;  %v217_v24 = vpack.c.bf16 %v45_v23, %v44_v22  ;;  %v29_v25 = vld [vmem:[%s298_s0 + $0x8] sm:$0xff]  ;;  %v135_v26 = vld [vmem:[%s300_s2] ss:$0 sm:$0xff] }
  0x1a   :  { %196 = vmatpush3.bf16.msra.mxu0 %v193_v5 }
  0x1b   :  { %198 = vmatprep.subr.bf16.mxu0 %v197_v8 }
  0x1e   :  { %200 = vmatpush3.bf16.msra.mxu0 %v197_v8 }
  0x1f   :  { %202 = vmatprep.subr.bf16.mxu0 %v201_v12 }
  0x22   :  { %204 = vmatpush3.bf16.msra.mxu0 %v201_v12 }
  0x23   :  { %206 = vmatprep.subr.bf16.mxu0 %v205_v15 }
  0x26   :  { %208 = vmatpush3.bf16.msra.mxu0 %v205_v15 }
  0x27   :  { %210 = vmatprep.subr.bf16.mxu0 %v209_v18 }
  0x2a   :  { %212 = vmatpush3.bf16.msra.mxu0 %v209_v18 }
  0x2b   :  { %214 = vmatprep.subr.bf16.mxu0 %v213_v21 }
  0x2e   :  { %216 = vmatpush3.bf16.msra.mxu0 %v213_v21 }
  0x2f   :  { %218 = vmatprep.subr.bf16.mxu0 %v217_v24 }
  0x32   :  { %220 = vmatpush3.bf16.msra.mxu0 %v217_v24 }
  0x35   :  { %187 = vmatmul.mubr.f32.vlgmr.msra.gmra.mrb[0].mxu0 %v29_v25 }
 0x108   :  { %v188_v27 = vpop.f32.mrb[0].mxu0 }
 0x109   :  { %v125_v28 = vadd.f32 %v188_v27, %v135_v26  ;;  %v119_v29 = vpop.f32.mrb[1].mxu0 }
 0x10a   :  { %v120_v30 = vadd.f32 %v135_v26, %v119_v29 }
 0x10b   :  { %129 = vst [vmem:[%s301_s3 + $0x8] sm:$0xff] %v125_v28 }
 0x10c   :  { %128 = vst [vmem:[%s301_s3] sm:$0xff] %v120_v30 }
 0x10d   :  { %134 = vsyncpa [#allocation3], 1 }

// kernel: attention_forward_train.2
= control target key start
LH: loop header
LB: loop body
LE: loop exit
PB: predicated region body
PF: predicated region fallthrough
CT: control target
= control target key end

     0   :  { %s2936_s0 = inlined_call_operand.hbm [shape: f32[2,16,128], index: 0, kind: input, shape index: {}]   ;;  %s2937_s1 = inlined_call_operand.hbm [shape: f32[5,2,512], index: 1, kind: input, shape index: {}]   ;;  %s2938_s2 = inlined_call_operand.hbm [shape: f32[128,128], index: 2, kind: input, shape index: {}]   ;;  %s2939_s3 = inlined_call_operand.hbm [shape: f32[128,128], index: 3, kind: input, shape index: {}]   ;;  %s2940_s4 = inlined_call_operand.hbm [shape: f32[1,128], index: 4, kind: input, shape index: {}]   ;;  %s2941_s5 = inlined_call_operand.hbm [shape: f32[1,128], index: 5, kind: input, shape index: {}]   ;;  %s2942_s6 = inlined_call_operand.hbm [shape: f32[128,512], index: 6, kind: input, shape index: {}]   ;;  %s2943_s7 = inlined_call_operand.hbm [shape: f32[128,512], index: 7, kind: input, shape index: {}]   ;;  %s2944_s8 = inlined_call_operand.hbm [shape: f32[1,512], index: 8, kind: input, shape index: {}]   ;;  %s2945_s9 = inlined_call_operand.hbm [shape: f32[5,2,128], index: 9, kind: output, shape index: {}]  }
   0x1   :  { %2954 = sst [smem:[#allocation30_spill]] %s2936_s0 }
   0x2   :  { %2955 = sst [smem:[#allocation31_spill]] %s2945_s9 }
   0x3   :  { %14 = vsyncpa [#allocation6], 0 }
   0x4   :  { %15 = vsyncpa [#allocation9], 0 }
   0x5   :  { %17 = vsyncpa [#allocation9 + $0x1], 0 }
   0x6   :  { %18 = vsyncpa [#allocation12], 0 }
   0x7   :  { %19 = vsyncpa [#allocation15], 0 }
   0x8   :  { %20 = vsyncpa [#allocation18], 0 }
   0x9   :  { %21 = vsyncpa [#allocation7], 0 }
   0xa   :  { %23 = vsyncpa [#allocation7 + $0x1], 0  ;;  %s2482_s30 = smov 0   ;;  %s2484_s10 = smov 0  }
   0xb   :  { %s2486_s11 = smov 0   ;;  %s2488_s12 = smov 0  }
   0xc   :  { %s2490_s13 = smov 0   ;;  %s2492_s14 = smov 0  }
   0xd LB: > { %2956 = sst [smem:[#allocation28_spill]] %s2402_s12  ;;  %s2513_s15 = sadd.s32 4294967295, %s2410_s14   ;;  %s2410_s14 = sphi %s2492_s14, %s29_s14   ;;  %s2406_s13 = sphi %s2490_s13, %s2992_s13   ;;  %s2402_s12 = sphi %s2488_s12, %s2991_s12   ;;  %s2398_s11 = sphi %s2486_s11, %s2990_s11   ;;  %s2394_s10 = sphi %s2484_s10, %s2989_s10   ;;  %s2390_s30 = sphi %s2482_s30, %s2988_s30  }
   0xe   : > { %p1523_p0 = scmp.ge.s32.totalorder %s2410_s14, 1  ;;  %p2948_p1 = scmp.eq.s32.totalorder %s2513_s15, 0 }
   0xf   : > { %p275_p2 = scmp.lt.s32.totalorder %s2410_s14, 6  ;;  %s2412_s17 = smov [#allocation10]  }
  0x10   : > { %s304_s18 = sshll.u32 %s2412_s17, 4  ;;  %s2413_s19 = smov [#allocation11]   ;;  %s2522_s18 = int_to_ptr.vmem [resolvable:$true] %s304_s18 }
  0x11   : > { %p2518_p3 = pnand %p1523_p0, %p275_p2  ;;  %s317_s20 = sshll.u32 %s2413_s19, 4  ;;  %s2532_s20 = int_to_ptr.vmem [resolvable:$true] %s317_s20 }
  0x12   : > { %s2414_s22 = smov [#allocation14]   ;;  %s2054_s26 = scalar_lea.hbm %s2938_s2, 2048 }
  0x13   : > { %s2957_s16 = scalar_select %p2518_p3, 1, 0 }
  0x14   : > { %p1908_p4 = pneg %p2518_p3  ;;  %s342_s23 = sshll.u32 %s2414_s22, 4  ;;  %s2534_s23 = int_to_ptr.vmem [resolvable:$true] %s342_s23 }
  0x15   : > { %2958 = sst [smem:[#allocation29_spill]] %s2957_s16  ;;  %p2055_p6 = scmp.ne.s32.totalorder %s2938_s2, %s2054_s26 }
  0x16   : > { %p2528_p5 = pnand %p1908_p4, %p2948_p1  ;;  %p2061_p10 = scmp.lt.u32.totalorder %s2054_s26, %s2938_s2 }
  0x18   : > { %p2544_p7 = pneg %p2528_p5 }
  0x1a   : > { %p2057_p8 = pnand %p2544_p7, %p2055_p6 }
  0x1c   : > { %p2058_p9 = pneg %p2057_p8 }
  0x1e   : > { %p2063_p11 = pnand %p2061_p10, %p2058_p9 }
  0x20   : > { %2066 = shalt.err (!%p2063_p11)
}
  0x21   : > { %s2067_s22 = scalar_lea.vmem %s2522_s18, 2048  ;;  %p2075_p2 = scmp.lt.s32.totalorder %s2522_s18, %s2522_s18 }
  0x22   : > { %p2068_p12 = scmp.ne.s32.totalorder %s2522_s18, %s2067_s22  ;;  %p2076_p4 = scmp.lt.s32.totalorder %s2067_s22, %s2067_s22 }
  0x24   : > { %p2070_p13 = pnand %p2068_p12, %p2544_p7  ;;  %p2077_p6 = por %p2076_p4, %p2075_p2 }
  0x26   : > { %p2071_p0 = pneg %p2070_p13 }
  0x28   : > { %p2078_p8 = pnand %p2077_p6, %p2071_p0 }
  0x2a   : > { %2081 = shalt.err (!%p2078_p8)
}
  0x2b   : > { %s2950_s24 = smov 128   ;;  %s2951_s25 = smov 8  }
  0x2c   : > { %1914 = dma.hbm_to_vmem [thread:$0]  (!%p2528_p5), %s2938_s2, 2048, %s2522_s18, [#allocation9], %s2950_s24, %s2950_s24, %s2951_s25  }
  0x2d   : > { %s2082_s19 = scalar_lea.hbm %s2939_s3, 2048 }
  0x2e   : > { %p2083_p9 = scmp.ne.s32.totalorder %s2939_s3, %s2082_s19  ;;  %p2089_p12 = scmp.lt.u32.totalorder %s2082_s19, %s2939_s3 }
  0x30   : > { %p2085_p10 = pnand %p2083_p9, %p2544_p7 }
  0x32   : > { %p2086_p11 = pneg %p2085_p10 }
  0x34   : > { %p2091_p13 = pnand %p2089_p12, %p2086_p11 }
  0x36   : > { %2094 = shalt.err (!%p2091_p13)
}
  0x37   : > { %s2095_s18 = scalar_lea.vmem %s2532_s20, 2048  ;;  %p2103_p6 = scmp.lt.s32.totalorder %s2532_s20, %s2532_s20 }
  0x38   : > { %p2096_p0 = scmp.ne.s32.totalorder %s2532_s20, %s2095_s18  ;;  %p2104_p8 = scmp.lt.s32.totalorder %s2095_s18, %s2095_s18 }
  0x3a   : > { %p2098_p2 = pnand %p2096_p0, %p2544_p7  ;;  %p2105_p9 = por %p2104_p8, %p2103_p6 }
  0x3c   : > { %p2099_p4 = pneg %p2098_p2 }
  0x3e   : > { %p2106_p10 = pnand %p2105_p9, %p2099_p4 }
  0x40   : > { %2109 = shalt.err (!%p2106_p10)
}
  0x41   : > { %1917 = dma.hbm_to_vmem [thread:$0]  (!%p2528_p5), %s2939_s3, 2048, %s2532_s20, [#allocation12], %s2950_s24, %s2950_s24, %s2951_s25  }
  0x42   : > { %s2110_s27 = scalar_lea.hbm %s2941_s5, 16 }
  0x43   : > { %p2111_p11 = scmp.ne.s32.totalorder %s2941_s5, %s2110_s27  ;;  %p2117_p0 = scmp.lt.u32.totalorder %s2110_s27, %s2941_s5 }
  0x45   : > { %p2113_p12 = pnand %p2111_p11, %p2544_p7 }
  0x47   : > { %p2114_p13 = pneg %p2113_p12 }
  0x49   : > { %p2119_p2 = pnand %p2117_p0, %p2114_p13 }
  0x4b   : > { %2122 = shalt.err (!%p2119_p2)
}
  0x4c   : > { %s2123_s20 = scalar_lea.vmem %s2534_s23, 16  ;;  %s2130_s18 = scalar_lea.vmem %s2534_s23, 32 }
  0x4d   : > { %p2124_p4 = scmp.ne.s32.totalorder %s2534_s23, %s2123_s20  ;;  %p2131_p9 = scmp.lt.s32.totalorder %s2534_s23, %s2534_s23 }
  0x4e   : > { %p2132_p10 = scmp.lt.s32.totalorder %s2130_s18, %s2123_s20 }
  0x4f   : > { %p2126_p6 = pnand %p2124_p4, %p2544_p7 }
  0x50   : > { %p2133_p11 = por %p2132_p10, %p2131_p9 }
  0x51   : > { %p2127_p8 = pneg %p2126_p6 }
  0x53   : > { %p2134_p12 = pnand %p2133_p11, %p2127_p8 }
  0x55   : > { %2137 = shalt.err (!%p2134_p12)
}
  0x56   : > { %1923 = dma.hbm_to_vmem [thread:$0]  (!%p2528_p5), %s2941_s5, 16, %s2534_s23, [#allocation15]  }
  0x57   : > { %s2417_s16 = smov [#allocation17]   ;;  %s2138_s17 = scalar_lea.hbm %s2943_s7, 8192 }
  0x58   : > { %s365_s26 = sshll.u32 %s2417_s16, 4  ;;  %p2139_p13 = scmp.ne.s32.totalorder %s2943_s7, %s2138_s17  ;;  %s366_s26 = int_to_ptr.vmem [resolvable:$true] %s365_s26 }
  0x59   : > { %p2145_p4 = scmp.lt.u32.totalorder %s2138_s17, %s2943_s7 }
  0x5a   : > { %p2141_p0 = pnand %p2139_p13, %p2544_p7 }
  0x5c   : > { %p2142_p2 = pneg %p2141_p0 }
  0x5e   : > { %p2147_p6 = pnand %p2145_p4, %p2142_p2 }
  0x60   : > { %2150 = shalt.err (!%p2147_p6)
}
  0x61   : > { %s2151_s23 = scalar_lea.vmem %s366_s26, 8192  ;;  %p2159_p11 = scmp.lt.s32.totalorder %s366_s26, %s366_s26 }
  0x62   : > { %p2152_p8 = scmp.ne.s32.totalorder %s366_s26, %s2151_s23  ;;  %p2160_p12 = scmp.lt.s32.totalorder %s2151_s23, %s2151_s23 }
  0x64   : > { %p2154_p9 = pnand %p2152_p8, %p2544_p7  ;;  %p2161_p1 = por %p2160_p12, %p2159_p11 }
  0x66   : > { %p2155_p10 = pneg %p2154_p9 }
  0x68   : > { %p2162_p3 = pnand %p2161_p1, %p2155_p10 }
  0x6a   : > { %2165 = shalt.err (!%p2162_p3)
}
  0x6b   : > { %s2952_s9 = smov 512   ;;  %s2419_s12 = smov 32  }
  0x6c   : > { %1929 = dma.hbm_to_vmem [thread:$0]  (!%p2528_p5), %s2943_s7, 8192, %s366_s26, [#allocation18], %s2952_s9, %s2952_s9, %s2419_s12  }
  0x6d   : > { %s2420_s28 = smov [#allocation5]   ;;  %s2421_s19 = smov [#allocation13]  }
  0x6e   : > { %s291_s17 = sshll.u32 %s2420_s28, 4  ;;  %s331_s22 = sshll.u32 %s2421_s19, 4  ;;  %s292_s17 = int_to_ptr.vmem [resolvable:$true] %s291_s17  ;;  %s2639_s22 = int_to_ptr.vmem [resolvable:$true] %s331_s22 }
  0x6f   : > { %s2961_s0 = sld [smem:[#allocation30_spill]] }
  0x75   : > { %s2166_s23 = scalar_lea.hbm %s2961_s0, 512 }
  0x76   : > { %p2167_p1 = scmp.ne.s32.totalorder %s2961_s0, %s2166_s23  ;;  %p2173_p0 = scmp.lt.u32.totalorder %s2166_s23, %s2961_s0 }
  0x78   : > { %p2169_p3 = pnand %p2167_p1, %p2544_p7 }
  0x7a   : > { %p2170_p13 = pneg %p2169_p3 }
  0x7c   : > { %p2175_p2 = pnand %p2173_p0, %p2170_p13 }
  0x7e   : > { %2178 = shalt.err (!%p2175_p2)
}
  0x7f   : > { %s2179_s27 = scalar_lea.vmem %s292_s17, 512  ;;  %p2187_p9 = scmp.lt.s32.totalorder %s292_s17, %s292_s17 }
  0x80   : > { %p2180_p4 = scmp.ne.s32.totalorder %s292_s17, %s2179_s27  ;;  %p2188_p10 = scmp.lt.s32.totalorder %s2179_s27, %s2179_s27 }
  0x82   : > { %p2182_p6 = pnand %p2180_p4, %p2544_p7  ;;  %p2189_p11 = por %p2188_p10, %p2187_p9 }
  0x84   : > { %p2183_p8 = pneg %p2182_p6 }
  0x86   : > { %p2190_p12 = pnand %p2189_p11, %p2183_p8 }
  0x88   : > { %2193 = shalt.err (!%p2190_p12)
}
  0x89   : > { %s2962_s24 = smov 8   ;;  %s2963_s25 = smov 128  }
  0x8a   : > { %1911 = dma.hbm_to_vmem [thread:$0]  (!%p2528_p5), %s2961_s0, 512, %s292_s17, [#allocation6], %s2963_s25, %s2963_s25, %s2962_s24  }
  0x8b   : > { %s2194_s23 = scalar_lea.hbm %s2940_s4, 16 }
  0x8c   : > { %p2195_p1 = scmp.ne.s32.totalorder %s2940_s4, %s2194_s23  ;;  %p2201_p0 = scmp.lt.u32.totalorder %s2194_s23, %s2940_s4 }
  0x8e   : > { %p2197_p3 = pnand %p2195_p1, %p2544_p7 }
  0x90   : > { %p2198_p13 = pneg %p2197_p3 }
  0x92   : > { %p2203_p2 = pnand %p2201_p0, %p2198_p13 }
  0x94   : > { %2206 = shalt.err (!%p2203_p2)
}
  0x95   : > { %s2207_s17 = scalar_lea.vmem %s2639_s22, 16  ;;  %s2214_s24 = scalar_lea.vmem %s2639_s22, 32 }
  0x96   : > { %p2208_p4 = scmp.ne.s32.totalorder %s2639_s22, %s2207_s17  ;;  %p2215_p9 = scmp.lt.s32.totalorder %s2639_s22, %s2639_s22 }
  0x97   : > { %p2216_p10 = scmp.lt.s32.totalorder %s2214_s24, %s2207_s17 }
  0x98   : > { %p2210_p6 = pnand %p2208_p4, %p2544_p7 }
  0x99   : > { %p2217_p11 = por %p2216_p10, %p2215_p9 }
  0x9a   : > { %p2211_p8 = pneg %p2210_p6 }
  0x9c   : > { %p2218_p12 = pnand %p2217_p11, %p2211_p8 }
  0x9e   : > { %2221 = shalt.err (!%p2218_p12)
}
  0x9f   : > { %1920 = dma.hbm_to_vmem [thread:$0]  (!%p2528_p5), %s2940_s4, 16, %s2639_s22, [#allocation12]  }
  0xa0   : > { %s2422_s28 = smov [#allocation16]   ;;  %s2423_s20 = smov [#allocation19]  }
  0xa1   : > { %s352_s19 = sshll.u32 %s2422_s28, 4  ;;  %s379_s18 = sshll.u32 %s2423_s20, 4  ;;  %s353_s19 = int_to_ptr.vmem [resolvable:$true] %s352_s19  ;;  %s2686_s18 = int_to_ptr.vmem [resolvable:$true] %s379_s18 }
  0xa2   : > { %s2222_s26 = scalar_lea.hbm %s2942_s6, 8192 }
  0xa3   : > { %p2223_p1 = scmp.ne.s32.totalorder %s2942_s6, %s2222_s26  ;;  %p2229_p0 = scmp.lt.u32.totalorder %s2222_s26, %s2942_s6 }
  0xa5   : > { %p2225_p3 = pnand %p2223_p1, %p2544_p7 }
  0xa7   : > { %p2226_p13 = pneg %p2225_p3 }
  0xa9   : > { %p2231_p2 = pnand %p2229_p0, %p2226_p13 }
  0xab   : > { %2234 = shalt.err (!%p2231_p2)
}
  0xac   : > { %s2235_s9 = scalar_lea.vmem %s353_s19, 8192  ;;  %p2243_p9 = scmp.lt.s32.totalorder %s353_s19, %s353_s19 }
  0xad   : > { %p2236_p4 = scmp.ne.s32.totalorder %s353_s19, %s2235_s9  ;;  %p2244_p10 = scmp.lt.s32.totalorder %s2235_s9, %s2235_s9 }
  0xaf   : > { %p2238_p6 = pnand %p2236_p4, %p2544_p7  ;;  %p2245_p11 = por %p2244_p10, %p2243_p9 }
  0xb1   : > { %p2239_p8 = pneg %p2238_p6 }
  0xb3   : > { %p2246_p12 = pnand %p2245_p11, %p2239_p8 }
  0xb5   : > { %2249 = shalt.err (!%p2246_p12)
}
  0xb6   : > { %s2964_s25 = smov 512   ;;  %s2250_s26 = scalar_lea.hbm %s2944_s8, 64 }
  0xb7   : > { %1926 = dma.hbm_to_vmem [thread:$0]  (!%p2528_p5), %s2942_s6, 8192, %s353_s19, [#allocation15], %s2964_s25, %s2964_s25, %s2419_s12  }
  0xb8   : > { %p2251_p1 = scmp.ne.s32.totalorder %s2944_s8, %s2250_s26  ;;  %p2257_p0 = scmp.lt.u32.totalorder %s2250_s26, %s2944_s8 }
  0xba   : > { %p2253_p3 = pnand %p2251_p1, %p2544_p7 }
  0xbc   : > { %p2254_p13 = pneg %p2253_p3 }
  0xbe   : > { %p2259_p2 = pnand %p2257_p0, %p2254_p13 }
  0xc0   : > { %2262 = shalt.err (!%p2259_p2)
}
  0xc1   : > { %s2263_s12 = scalar_lea.vmem %s2686_s18, 64  ;;  %p2271_p9 = scmp.lt.s32.totalorder %s2686_s18, %s2686_s18 }
  0xc2   : > { %p2264_p4 = scmp.ne.s32.totalorder %s2686_s18, %s2263_s12  ;;  %p2272_p10 = scmp.lt.s32.totalorder %s2263_s12, %s2263_s12 }
  0xc4   : > { %p2266_p6 = pnand %p2264_p4, %p2544_p7  ;;  %p2273_p11 = por %p2272_p10, %p2271_p9 }
  0xc6   : > { %p2267_p8 = pneg %p2266_p6 }
  0xc8   : > { %p2274_p12 = pnand %p2273_p11, %p2267_p8 }
  0xca   : > { %2277 = shalt.err (!%p2274_p12)
}
  0xcb   : > { %1932 = dma.hbm_to_vmem [thread:$0]  (!%p2528_p5), %s2944_s8, 64, %s2686_s18, [#allocation18]  }
  0xcc   : > { %s1522_s29 = sadd.s32 4294967294, %s2410_s14   ;;  %s38_s25 = sadd.s32 1, %s2406_s13 }
  0xcd   : > { %p39_p7 = scmp.ge.s32.totalorder %s38_s25, 5  ;;  %s76_s21 = sadd.s32 1, %s2398_s11 }
  0xce   : > { %p83_p1 = scmp.ne.s32.totalorder %s2398_s11, %s2394_s10  ;;  %p84_p3 = scmp.eq.s32.totalorder %s2410_s14, 0 }
  0xcf   : > { %s2994_s25 = smov (%p39_p7, %s38_s25), 0  ;;  %p89_p0 = scmp.ne.s32.totalorder %s2394_s10, %s2390_s30 }
  0xd0   : > { %p2740_p13 = por %p84_p3, %p83_p1  ;;  %s71_s18 = ssub.s32 %s2406_s13, %s2994_s25 }
  0xd1   : > { %p262_p5 = scmp.eq.s32.totalorder %s2513_s15, 4  ;;  %p74_p2 = scmp.eq.s32.totalorder %s71_s18, 0 }
  0xd2   : > { %p2966_p4 = scmp.eq.s32.totalorder %s2513_s15, 0  ;;  %p268_p9 = scmp.eq.s32.totalorder %s1522_s29, 4 }
  0xd3   : > { %p2755_p8 = por %p262_p5, %p83_p1  ;;  %p1949_p11 = scmp.lt.s32.totalorder %s2410_s14, 5 }
  0xd4   : > { %p2751_p6 = por %p2966_p4, %p89_p0  ;;  %p2762_p10 = por %p268_p9, %p89_p0 }
  0xd5   : > { %s2968_s23 = scalar_select %p2755_p8, 1, 0 }
  0xd6   : > { %s2760_s16 = scalar_select %p74_p2, %s2398_s11, %s76_s21  }
  0xd7   : > { %s2969_s26 = scalar_select %p2762_p10, 1, 0 }
  0xd8   : > { %s390_s27 = sand.u32 1, %s2410_s14   ;;  %s392_s17 = sand.u32 1, %s2398_s11  }
  0xd9   : > { %s1533_s24 = sshll.u32 %s392_s17, 3  ;;  %s1557_s22 = sshll.u32 %s2406_s13, 7 }
  0xda   : > { %s2773_s9 = scalar_lea.hbm %s2937_s1, %s1557_s22  ;;  %s394_s29 = scalar_lea.vmem [#allocation8], %s1533_s24 }
  0xdb   : > { %s404_s21 = sshll.u32 %s394_s29, 4  ;;  %p2779_p12 = pnand %p1949_p11, %p2740_p13  ;;  %s2775_s21 = int_to_ptr.vmem [resolvable:$true] %s404_s21 }
  0xdc   : > { %s391_s17 = scalar_lea.sflag [#allocation9], %s390_s27  ;;  %s2278_s0 = scalar_lea.hbm %s2773_s9, 128 }
  0xdd   : > { %p2279_p7 = scmp.ne.s32.totalorder %s2773_s9, %s2278_s0  ;;  %p2280_p1 = pneg %p2779_p12 }
  0xde   : > { %s2283_s12 = scalar_lea.hbm %s2937_s1, 640  ;;  %p2284_p13 = scmp.lt.u32.totalorder %s2773_s9, %s2937_s1 }
  0xdf   : > { %p2281_p3 = pnand %p2280_p1, %p2279_p7  ;;  %p2285_p5 = scmp.lt.u32.totalorder %s2283_s12, %s2278_s0 }
  0xe0   : > { %p2287_p4 = scmp.lt.u32.totalorder %s2278_s0, %s2773_s9 }
  0xe1   : > { %p2282_p0 = pneg %p2281_p3  ;;  %p2286_p2 = por %p2285_p5, %p2284_p13 }
  0xe3   : > { %p2288_p9 = por %p2287_p4, %p2286_p2 }
  0xe5   : > { %p2289_p11 = pnand %p2288_p9, %p2282_p0 }
  0xe7   : > { %2292 = shalt.err (!%p2289_p11)
}
  0xe8   : > { %s2293_s27 = scalar_lea.vmem %s2775_s21, 128  ;;  %s2424_s29 = smov [#allocation8]  }
  0xe9   : > { %p2294_p7 = scmp.ne.s32.totalorder %s2775_s21, %s2293_s27  ;;  %s2298_s24 = sshll.u32 %s2424_s29, 4  ;;  %s2299_s24 = int_to_ptr.vmem [resolvable:$false] %s2298_s24 }
  0xea   : > { %s2300_s22 = scalar_lea.vmem %s2299_s24, 256  ;;  %p2301_p8 = scmp.lt.s32.totalorder %s2775_s21, %s2299_s24 }
  0xeb   : > { %p2296_p3 = pnand %p2294_p7, %p2280_p1  ;;  %p2302_p13 = scmp.lt.s32.totalorder %s2300_s22, %s2293_s27 }
  0xed   : > { %p2297_p10 = pneg %p2296_p3  ;;  %p2303_p5 = por %p2302_p13, %p2301_p8 }
  0xef   : > { %p2304_p2 = pnand %p2303_p5, %p2297_p10 }
  0xf1   : > { %2307 = shalt.err (!%p2304_p2)
}
  0xf2   : > { %1936 = dma.hbm_to_vmem [thread:$0]  (!%p2779_p12), %s2773_s9, 128, %s2775_s21, %s391_s17  }
  0xf3   : > { %s2971_s0 = sld [smem:[#allocation29_spill]] }
  0xf9   : > { %p2972_p0 = scmp.ne.s32.totalorder %s2971_s0, 0 }
  0xfa   : > { %p2973_p1 = scmp.eq.s32.totalorder (!%p2972_p0), %s2513_s15, 0 }
  0xfb   : > { %413 = sbr.rel (%p2972_p0) target bundleno = 1683 (0x693), region = 56 }
 0x102   : > { %2361 = dma.done.wait (%p2973_p1), [#allocation6], 512   ;;  %p2974_p4 = pmov %p2973_p1 }
 0x103   : > { %s419_s12 = sand.u32 1, %s2513_s15   ;;  %s2816_s28 = sand.u32 1, %s2394_s10  }
 0x104   : > { %2363 = vsyncadd (%p2974_p4), [#allocation6], 4294966784  ;;  %s1538_s18 = sshll.u32 %s2816_s28, 3  ;;  %s420_s19 = scalar_lea.sflag [#allocation9], %s419_s12 }
 0x105   : > { %s2819_s27 = scalar_lea.vmem [#allocation8], %s1538_s18 }
 0x106   : > { %2365 = dma.done.wait (%p2751_p6), %s420_s19, 128  }
 0x107   : > { %2367 = vsyncadd (%p2751_p6), %s420_s19, 4294967168  ;;  %p2975_p8 = pmov %p2973_p1 }
 0x108   : > { %p2976_p10 = pmov %p2973_p1 }
 0x109   : > { %2369 = dma.done.wait (%p2975_p8), [#allocation9], 2048  }
 0x10a   : > { %2371 = vsyncadd (%p2976_p10), [#allocation9], 4294965248  ;;  %p2977_p12 = pmov %p2973_p1 }
 0x10b   : > { %p2978_p9 = pmov %p2973_p1 }
 0x10c   : > { %2373 = dma.done.wait (%p2977_p12), [#allocation12], 2064  }
 0x10d   : > { %2375 = vsyncadd (%p2978_p9), [#allocation12], 4294965232  ;;  %p2979_p11 = pmov %p2973_p1 }
 0x10e   : > { %p2980_p7 = pmov %p2973_p1 }
 0x10f   : > { %2377 = dma.done.wait (%p2979_p11), [#allocation15], 8208  }
 0x110   : > { %2379 = vsyncadd (%p2980_p7), [#allocation15], 4294959088  ;;  %p2981_p6 = pmov %p2973_p1 }
 0x111   : > { %p2982_p3 = pmov %p2973_p1 }
 0x112   : > { %2381 = dma.done.wait (%p2981_p6), [#allocation18], 8256  }
 0x113   : > { %2383 = vsyncadd (%p2982_p3), [#allocation18], 4294959040  ;;  %s1546_s20 = sshll.u32 %s2816_s28, 1  ;;  %s2983_s21 = sld [smem:[#allocation28_spill]] }
 0x114   : > { %s2842_s9 = scalar_lea.vmem [#allocation20], %s1546_s20 }
 0x119   : > { %p1547_p13 = scmp.ne.s32.totalorder %s2983_s21, 0 }
 0x11a   : > { %v497_v0 = vld [vmem:[#allocation10] sm:$0xff] (!%p1547_p13)  ;;  %v498_v1 = vld [vmem:[#allocation10 + $0x8] sm:$0xff] (!%p1547_p13)  ;;  %v499_v2 = vld [vmem:[#allocation10 + $0x10] sm:$0xff] (!%p1547_p13)  ;;  %v2425_v3 = vmov (!%p1547_p13), 0.0  }
 0x11b   : > { %490 = sbr.rel (%p1547_p13) target bundleno = 531 (0x213), region = 96  ;;  %491 = vst [vmem:[#allocation3] sm:$0x3] (!%p1547_p13), %v2425_v3  ;;  %492 = vst [vmem:[#allocation4] sm:$0x3] (!%p1547_p13), %v2425_v3  ;;  %v1668_v4 = vpack.c.bf16 (!%p1547_p13), %v498_v1, %v497_v0  ;;  %v500_v5 = vld [vmem:[#allocation10 + $0x18] sm:$0xff] (!%p1547_p13) }
 0x11c   : > { %v1672_v6 = vpack.c.bf16 (!%p1547_p13), %v500_v5, %v499_v2  ;;  %v501_v7 = vld [vmem:[#allocation10 + $0x20] sm:$0xff] (!%p1547_p13)  ;;  %v502_v8 = vld [vmem:[#allocation10 + $0x28] sm:$0xff] (!%p1547_p13)  ;;  %v493_v10 = vld [vmem:[#allocation5] sm:$0xff] (!%p1547_p13) }
 0x11d   : > { %1669 = vmatprep.subr.bf16.mxu0 (!%p1547_p13), %v1668_v4  ;;  %1852 = vmatprep.subr.bf16.mxu1 (!%p1547_p13), %v1668_v4  ;;  %v1676_v9 = vpack.c.bf16 (!%p1547_p13), %v502_v8, %v501_v7  ;;  %v495_v11 = vld [vmem:[#allocation5 + $0x10] sm:$0xff] (!%p1547_p13)  ;;  %v503_v12 = vld [vmem:[#allocation10 + $0x30] sm:$0xff] (!%p1547_p13)  ;;  %v504_v13 = vld [vmem:[#allocation10 + $0x38] sm:$0xff] (!%p1547_p13) }
 0x11e   : > { %1671 = vmatpush3.bf16.msra.mxu0 (!%p1547_p13), %v1668_v4  ;;  %1860 = vmatpush3.bf16.msra.mxu1 (!%p1547_p13), %v1668_v4  ;;  %v1680_v14 = vpack.c.bf16 (!%p1547_p13), %v504_v13, %v503_v12  ;;  %v505_v15 = vld [vmem:[#allocation10 + $0x40] sm:$0xff] (!%p1547_p13)  ;;  %v506_v16 = vld [vmem:[#allocation10 + $0x48] sm:$0xff] (!%p1547_p13)  ;;  %v507_v18 = vld [vmem:[#allocation10 + $0x50] sm:$0xff] (!%p1547_p13) }
 0x11f   : > { %1673 = vmatprep.subr.bf16.mxu0 (!%p1547_p13), %v1672_v6  ;;  %1853 = vmatprep.subr.bf16.mxu1 (!%p1547_p13), %v1672_v6  ;;  %v1684_v17 = vpack.c.bf16 (!%p1547_p13), %v506_v16, %v505_v15  ;;  %v508_v19 = vld [vmem:[#allocation10 + $0x58] sm:$0xff] (!%p1547_p13)  ;;  %v509_v21 = vld [vmem:[#allocation10 + $0x60] sm:$0xff] (!%p1547_p13)  ;;  %v510_v22 = vld [vmem:[#allocation10 + $0x68] sm:$0xff] (!%p1547_p13) }
 0x120   : > { %1627 = vmatprep.mubr.f32.mxu0 (!%p1547_p13), %v493_v10  ;;  %1630 = vmatprep.mubr.f32.mxu1 (!%p1547_p13), %v495_v11  ;;  %v1688_v20 = vpack.c.bf16 (!%p1547_p13), %v508_v19, %v507_v18  ;;  %v1692_v23 = vpack.c.bf16 (!%p1547_p13), %v510_v22, %v509_v21  ;;  %v511_v24 = vld [vmem:[#allocation10 + $0x70] sm:$0xff] (!%p1547_p13)  ;;  %v512_v25 = vld [vmem:[#allocation10 + $0x78] sm:$0xff] (!%p1547_p13)  ;;  %v496_v28 = vld [vmem:[#allocation5 + $0x18] sm:$0xff] (!%p1547_p13) }
 0x121   : > { %v1696_v26 = vpack.c.bf16 (!%p1547_p13), %v512_v25, %v511_v24  ;;  %v494_v27 = vld [vmem:[#allocation5 + $0x8] sm:$0xff] (!%p1547_p13) }
 0x122   : > { %1675 = vmatpush3.bf16.msra.mxu0 %v1672_v6  ;;  %1861 = vmatpush3.bf16.msra.mxu1 %v1672_v6 }
 0x123   : > { %1677 = vmatprep.subr.bf16.mxu0 %v1676_v9  ;;  %1854 = vmatprep.subr.bf16.mxu1 %v1676_v9 }
 0x126   : > { %1679 = vmatpush3.bf16.msra.mxu0 %v1676_v9  ;;  %1862 = vmatpush3.bf16.msra.mxu1 %v1676_v9 }
 0x127   : > { %1681 = vmatprep.subr.bf16.mxu0 %v1680_v14  ;;  %1855 = vmatprep.subr.bf16.mxu1 %v1680_v14 }
 0x12a   : > { %1683 = vmatpush3.bf16.msra.mxu0 %v1680_v14  ;;  %1863 = vmatpush3.bf16.msra.mxu1 %v1680_v14 }
 0x12b   : > { %1685 = vmatprep.subr.bf16.mxu0 %v1684_v17  ;;  %1856 = vmatprep.subr.bf16.mxu1 %v1684_v17 }
 0x12e   : > { %1687 = vmatpush3.bf16.msra.mxu0 %v1684_v17  ;;  %1864 = vmatpush3.bf16.msra.mxu1 %v1684_v17 }
 0x12f   : > { %1689 = vmatprep.subr.bf16.mxu0 %v1688_v20  ;;  %1857 = vmatprep.subr.bf16.mxu1 %v1688_v20 }
 0x132   : > { %1691 = vmatpush3.bf16.msra.mxu0 %v1688_v20  ;;  %1865 = vmatpush3.bf16.msra.mxu1 %v1688_v20 }
 0x133   : > { %1693 = vmatprep.subr.bf16.mxu0 %v1692_v23  ;;  %1858 = vmatprep.subr.bf16.mxu1 %v1692_v23 }
 0x136   : > { %1695 = vmatpush3.bf16.msra.mxu0 %v1692_v23  ;;  %1866 = vmatpush3.bf16.msra.mxu1 %v1692_v23 }
 0x137   : > { %1697 = vmatprep.subr.bf16.mxu0 %v1696_v26  ;;  %1859 = vmatprep.subr.bf16.mxu1 %v1696_v26 }
 0x13a   : > { %1699 = vmatpush3.bf16.msra.mxu0 %v1696_v26  ;;  %1867 = vmatpush3.bf16.msra.mxu1 %v1696_v26 }
 0x13d   : > { %1628 = vmatmul.mubr.f32.vlgmr.msra.gmra.mrb[0].mxu0 %v494_v27  ;;  %1631 = vmatmul.mubr.f32.vlgmr.msra.gmra.mrb[0].mxu1 %v496_v28 }
 0x210   : > { %v1629_v29 = vpop.f32.mrb[0].mxu0  ;;  %v1632_v30 = vpop.f32.mrb[0].mxu1 }
 0x211   : > { %599 = vst [vmem:[#allocation2 + $0x8] sm:$0xff] %v1629_v29  ;;  %601 = vst [vmem:[#allocation2 + $0x18] sm:$0xff] %v1632_v30  ;;  %v579_v31 = vpop.f32.mrb[1].mxu0  ;;  %v589_v32 = vpop.f32.mrb[1].mxu1 }
 0x212   : > { %598 = vst [vmem:[#allocation2] sm:$0xff] %v579_v31  ;;  %600 = vst [vmem:[#allocation2 + $0x10] sm:$0xff] %v589_v32 }
 0x213 PF: > { %v608_v33 = vld [vmem:[#allocation11] sm:$0xff]  ;;  %v609_v34 = vld [vmem:[#allocation11 + $0x8] sm:$0xff]  ;;  %v610_v35 = vld [vmem:[#allocation11 + $0x10] sm:$0xff]  ;;  %v2426_v36 = vmov 0.0|0.0   ;;  %vm2427_vm0 = vmmov 0   ;;  %v2428_v39 = vmov 0.0   ;;  %v705_v62 = vlaneseq }
 0x214   : > { %1700 = vmatprep.subr.bf16.mxu0 %v2426_v36  ;;  %v1701_v37 = vpack.c.bf16 %v609_v34, %v608_v33  ;;  %v611_v38 = vld [vmem:[#allocation11 + $0x18] sm:$0xff]  ;;  %1665 = vmatprep.mubr.msk.f32.mxu0 %vm2427_vm0, %v2428_v39  ;;  %v612_v41 = vld [vmem:[#allocation11 + $0x20] sm:$0xff]  ;;  %v613_v42 = vld [vmem:[#allocation11 + $0x28] sm:$0xff]  ;;  %v2429_v60 = vmov 1966171168   ;;  %vm777_vm1 = vcmask 130112  }
 0x215   : > { %1040 = vmatprep.mubr.f32.mxu1 %v2428_v39  ;;  %v1704_v40 = vpack.c.bf16 %v611_v38, %v610_v35  ;;  %v1707_v43 = vpack.c.bf16 %v613_v42, %v612_v41  ;;  %v614_v44 = vld [vmem:[#allocation11 + $0x30] sm:$0xff]  ;;  %v615_v45 = vld [vmem:[#allocation11 + $0x38] sm:$0xff]  ;;  %v616_v47 = vld [vmem:[#allocation11 + $0x40] sm:$0xff]  ;;  %v703_v61 = vunpack.c.l.s4 %v2429_v60  ;;  %v2851_v0 = vshrl.u32 %v705_v62, 7  ;;  %s2984_s15 = sld [smem:[#allocation28_spill]]  ;;  %s1359_s29 = sshll.u32 %s2842_s9, 4  ;;  %s2889_s29 = int_to_ptr.vmem [resolvable:$true] %s1359_s29 }
 0x216   : > { %1702 = vmatpush3.bf16.msra.mxu0 %v1701_v37  ;;  %v1710_v46 = vpack.c.bf16 %v615_v45, %v614_v44  ;;  %v617_v48 = vld [vmem:[#allocation11 + $0x48] sm:$0xff]  ;;  %v618_v50 = vld [vmem:[#allocation11 + $0x50] sm:$0xff]  ;;  %v619_v51 = vld [vmem:[#allocation11 + $0x58] sm:$0xff]  ;;  %v762_v30 = vand.u32 127, %v705_v62  ;;  %vm788_vm2 = vcmask 1041409   ;;  %vm792_vm4 = vcmask 123904  }
 0x217   : > { %1703 = vmatprep.subr.bf16.mxu0 %v2426_v36  ;;  %v1713_v49 = vpack.c.bf16 %v617_v48, %v616_v47  ;;  %v1716_v52 = vpack.c.bf16 %v619_v51, %v618_v50  ;;  %v620_v53 = vld [vmem:[#allocation11 + $0x60] sm:$0xff]  ;;  %v621_v54 = vld [vmem:[#allocation11 + $0x68] sm:$0xff]  ;;  %v622_v56 = vld [vmem:[#allocation11 + $0x70] sm:$0xff]  ;;  %v704_v63 = vunpack.c.0.s8 %v703_v61  ;;  %v2855_v7 = vsub.s32 0, %v2851_v0  ;;  %s2985_s0 = sld [smem:[#allocation31_spill]]  ;;  %s1345_s18 = scalar_lea.sflag [#allocation7], %s2816_s28 }
 0x218   : > { %v1719_v55 = vpack.c.bf16 %v621_v54, %v620_v53  ;;  %v623_v57 = vld [vmem:[#allocation11 + $0x78] sm:$0xff]  ;;  %v2847_v59 = vld [vmem:[#allocation3] sm:$0x3]  ;;  %v1548_v1 = vld [vmem:[#allocation13] ss:$0 sm:$0xff]  ;;  %v772_v31 = vadd.s32 4294967288, %v762_v30  ;;  %v770_v35 = vsub.s32 %v762_v30, %v2851_v0 }
 0x219   : > { %v1722_v58 = vpack.c.bf16 %v623_v57, %v622_v56  ;;  %v707_v2 = vsub.s32 %v704_v63, %v2851_v0  ;;  %v604_v10 = vld [vmem:[#allocation2] sm:$0xff]  ;;  %v605_v11 = vld [vmem:[#allocation2 + $0x8] sm:$0xff]  ;;  %v606_v14 = vld [vmem:[#allocation2 + $0x10] sm:$0xff]  ;;  %vm763_vm3 = vcmp.lt.s32.totalorder %v762_v30, 10  ;;  %s2308_s19 = scalar_lea.vmem %s2889_s29, 32  ;;  %p2986_p2 = scmp.ne.s32.totalorder %s2968_s23, 0 }
 0x21a   : > { %1705 = vmatpush3.bf16.msra.mxu0 %v1704_v40  ;;  %v607_v15 = vld [vmem:[#allocation2 + $0x18] sm:$0xff]  ;;  %v1549_v21 = vld [vmem:[#allocation14] ss:$0 sm:$0xff]  ;;  %v775_v33 = vsub.s32 %v772_v31, %v2851_v0  ;;  %v913_v53 = vld [vmem:[#allocation17 + $0x8] sm:$0xff]  ;;  %p2309_p5 = scmp.ne.s32.totalorder %s2889_s29, %s2308_s19 }
 0x21b   : > { %1706 = vmatprep.subr.bf16.mxu0 %v2426_v36  ;;  %v917_v54 = vld [vmem:[#allocation17 + $0x28] sm:$0xff]  ;;  %v919_v57 = vld [vmem:[#allocation17 + $0x38] sm:$0xff]  ;;  %v916_v60 = vld [vmem:[#allocation17 + $0x20] sm:$0xff]  ;;  %s1554_s17 = sshll.u32 %s2984_s15, 5 }
 0x21c   : > { %v1724_v56 = vpack.c.bf16 %v917_v54, %v913_v53  ;;  %v914_v63 = vld [vmem:[#allocation17 + $0x10] sm:$0xff]  ;;  %v957_v53 = vld [vmem:[#allocation17 + $0x168] sm:$0xff]  ;;  %v955_v54 = vld [vmem:[#allocation17 + $0x158] sm:$0xff]  ;;  %p2310_p0 = pnand %p2309_p5, %p2986_p2 }
 0x21d   : > { %s2887_s12 = scalar_lea.hbm %s2985_s0, %s1554_s17 }
 0x21e   : > { %1708 = vmatpush3.bf16.msra.mxu0 %v1707_v43  ;;  %1725 = vmatprep.subr.bf16.mxu1 %v1724_v56  ;;  %p2311_p1 = pneg %p2310_p0 }
 0x21f   : > { %1709 = vmatprep.subr.bf16.mxu0 %v2426_v36 }
 0x222   : > { %1711 = vmatpush3.bf16.msra.mxu0 %v1710_v46 }
 0x223   : > { %1712 = vmatprep.subr.bf16.mxu0 %v2426_v36 }
 0x226   : > { %1714 = vmatpush3.bf16.msra.mxu0 %v1713_v49 }
 0x227   : > { %1715 = vmatprep.subr.bf16.mxu0 %v2426_v36 }
 0x22a   : > { %1717 = vmatpush3.bf16.msra.mxu0 %v1716_v52 }
 0x22b   : > { %1718 = vmatprep.subr.bf16.mxu0 %v2426_v36 }
 0x22e   : > { %1720 = vmatpush3.bf16.msra.mxu0 %v1719_v55  ;;  %v915_v55 = vld [vmem:[#allocation17 + $0x18] sm:$0xff] }
 0x22f   : > { %1721 = vmatprep.subr.bf16.mxu0 %v2426_v36  ;;  %v1756_v61 = vpack.c.bf16 %v919_v57, %v915_v55  ;;  %v959_v55 = vld [vmem:[#allocation17 + $0x178] sm:$0xff] }
 0x232   : > { %1723 = vmatpush3.bf16.msra.mxu0 %v1722_v58  ;;  %v912_v58 = vld [vmem:[#allocation17] sm:$0xff] }
 0x233   : > { %v1726_v62 = vpack.c.bf16 %v916_v60, %v912_v58  ;;  %1757 = vmatprep.subr.bf16.mxu0 %v1756_v61  ;;  %v952_v60 = vld [vmem:[#allocation17 + $0x140] sm:$0xff] }
 0x234   : > { %v956_v61 = vld [vmem:[#allocation17 + $0x160] sm:$0xff] }
 0x235   : > { %1666 = vmatmul.mubr.f32.vlgmr.msra.gmra.mrb[0].mxu0 %v2847_v59  ;;  %1727 = vmatpush1.bf16.msra.mxu1 %v1726_v62  ;;  %v954_v62 = vld [vmem:[#allocation17 + $0x150] sm:$0xff] }
 0x236   : > { %1111 = vmatprep.mubr.f32.mxu0 %v2428_v39 }
 0x308   : > { %v697_v3 = vpop.f32.mrb[0].mxu0 }
 0x309   : > { %v698_v4 = vadd.f32 %v1548_v1, %v697_v3  ;;  %v1667_v5 = vpop.f32.mrb[1].mxu0  ;;  %v918_v1 = vld [vmem:[#allocation17 + $0x30] sm:$0xff] }
 0x30a   : > { %v1758_v3 = vpack.c.bf16 %v918_v1, %v914_v63  ;;  %v923_v5 = vld [vmem:[#allocation17 + $0x58] sm:$0xff]  ;;  %v1776_v63 = vpack.c.bf16 %v959_v55, %v955_v54  ;;  %v958_v1 = vld [vmem:[#allocation17 + $0x170] sm:$0xff] }
 0x30b   : > { %v708_v6 = vrot.slane %v698_v4, %v707_v2  ;;  %v925_v4 = vld [vmem:[#allocation17 + $0x68] sm:$0xff] }
 0x30c   : > { %1759 = vmatpush1.bf16.msra.mxu0 %v1758_v3  ;;  %v965_v3 = vld [vmem:[#allocation17 + $0x1a8] sm:$0xff] }
 0x30d   : > { %v709_v8 = vcombine.high %v708_v6, %v708_v6  ;;  %v716_v9 = vrot.slane %v708_v6, %v707_v2  ;;  %v927_v6 = vld [vmem:[#allocation17 + $0x78] sm:$0xff] }
 0x30f   : > { %v723_v12 = vrot.slane %v709_v8, %v707_v2  ;;  %v727_v13 = vrot.slane %v716_v9, %v2855_v7  ;;  %v921_v2 = vld [vmem:[#allocation17 + $0x48] sm:$0xff]  ;;  %v1760_v9 = vpack.c.bf16 %v927_v6, %v923_v5  ;;  %v967_v5 = vld [vmem:[#allocation17 + $0x1b8] sm:$0xff]  ;;  %v1746_v6 = vpack.c.bf16 %v956_v61, %v952_v60 }
 0x310   : > { %v1728_v8 = vpack.c.bf16 %v925_v4, %v921_v2  ;;  %v961_v2 = vld [vmem:[#allocation17 + $0x188] sm:$0xff]  ;;  %v963_v4 = vld [vmem:[#allocation17 + $0x198] sm:$0xff] }
 0x311   : > { %v731_v16 = vrot.slane %v723_v12, %v2855_v7  ;;  %v734_v17 = vadd.f32 %v727_v13, %v604_v10  ;;  %v735_v18 = vadd.f32 %v727_v13, %v605_v11  ;;  %v920_v10 = vld [vmem:[#allocation17 + $0x40] sm:$0xff]  ;;  %v922_v12 = vld [vmem:[#allocation17 + $0x50] sm:$0xff]  ;;  %1761 = vmatprep.subr.bf16.mxu0 %v1760_v9  ;;  %v1748_v9 = vpack.c.bf16 %v965_v3, %v961_v2  ;;  %v871_v61 = vld [vmem:[#allocation16 + $0xb8] sm:$0xff] }
 0x312   : > { %v924_v11 = vld [vmem:[#allocation17 + $0x60] sm:$0xff]  ;;  %1729 = vmatprep.subr.bf16.mxu1 %v1728_v8  ;;  %v1778_v8 = vpack.c.bf16 %v958_v1, %v954_v62  ;;  %v866_v1 = vld [vmem:[#allocation16 + $0x90] sm:$0xff] }
 0x313   : > { %v736_v19 = vadd.f32 %v731_v16, %v606_v14  ;;  %2026 = vtanh.f32 %v734_v17  ;;  %v737_v20 = vadd.f32 %v731_v16, %v607_v15  ;;  %v1730_v13 = vpack.c.bf16 %v924_v11, %v920_v10  ;;  %v926_v14 = vld [vmem:[#allocation17 + $0x70] sm:$0xff]  ;;  %v929_v15 = vld [vmem:[#allocation17 + $0x88] sm:$0xff]  ;;  %v960_v10 = vld [vmem:[#allocation17 + $0x180] sm:$0xff] }
 0x314   : > { %2028 = vtanh.f32 %v735_v18  ;;  %v933_v16 = vld [vmem:[#allocation17 + $0xa8] sm:$0xff]  ;;  %v1762_v17 = vpack.c.bf16 %v926_v14, %v922_v12  ;;  %v964_v11 = vld [vmem:[#allocation17 + $0x1a0] sm:$0xff]  ;;  %v962_v12 = vld [vmem:[#allocation17 + $0x190] sm:$0xff] }
 0x315   : > { %2030 = vtanh.f32 %v736_v19  ;;  %v1732_v18 = vpack.c.bf16 %v933_v16, %v929_v15  ;;  %v931_v19 = vld [vmem:[#allocation17 + $0x98] sm:$0xff]  ;;  %1731 = vmatpush1.bf16.msra.mxu1 %v1730_v13  ;;  %v1780_v13 = vpack.c.bf16 %v967_v5, %v963_v4  ;;  %v966_v14 = vld [vmem:[#allocation17 + $0x1b0] sm:$0xff]  ;;  %v969_v15 = vld [vmem:[#allocation17 + $0x1c8] sm:$0xff] }
 0x316   : > { %2032 = vtanh.f32 %v737_v20  ;;  %v935_v20 = vld [vmem:[#allocation17 + $0xb8] sm:$0xff]  ;;  %1763 = vmatpush1.bf16.msra.mxu0 %v1762_v17  ;;  %v973_v16 = vld [vmem:[#allocation17 + $0x1e8] sm:$0xff]  ;;  %v870_v2 = vld [vmem:[#allocation16 + $0xb0] sm:$0xff] }
 0x317   : > { %1733 = vmatprep.subr.bf16.mxu1 %v1732_v18  ;;  %v971_v17 = vld [vmem:[#allocation17 + $0x1d8] sm:$0xff]  ;;  %v1830_v4 = vpack.c.bf16 %v870_v2, %v866_v1  ;;  %v873_v5 = vld [vmem:[#allocation16 + $0xc8] sm:$0xff]  ;;  %v904_v1 = vld [vmem:[#allocation16 + $0x1c0] sm:$0xff] }
 0x318   : > { %v975_v18 = vld [vmem:[#allocation17 + $0x1f8] sm:$0xff]  ;;  %v908_v2 = vld [vmem:[#allocation16 + $0x1e0] sm:$0xff] }
 0x31d   : > { %v2027_v22 = vpop.eup %2026 }
 0x31e   : > { %v749_v23 = vmul.f32 %v2027_v22, %v1549_v21  ;;  %v2029_v24 = vpop.eup %2028  ;;  %v1764_v22 = vpack.c.bf16 %v935_v20, %v931_v19  ;;  %v1750_v19 = vpack.c.bf16 %v964_v11, %v960_v10  ;;  %v1782_v20 = vpack.c.bf16 %v966_v14, %v962_v12  ;;  %v872_v10 = vld [vmem:[#allocation16 + $0xc0] sm:$0xff]  ;;  %v878_v14 = vld [vmem:[#allocation16 + $0xf0] sm:$0xff] }
 0x31f   : > { %v2031_v25 = vpop.eup %2030  ;;  %v750_v28 = vmul.f32 %v2029_v24, %v1549_v21  ;;  %v930_v24 = vld [vmem:[#allocation17 + $0x90] sm:$0xff]  ;;  %v876_v12 = vld [vmem:[#allocation16 + $0xe0] sm:$0xff] }
 0x320   : > { %753 = vadd.xlane.f32.xlu0 %v749_v23  ;;  %v751_v26 = vmul.f32 %v2031_v25, %v1549_v21  ;;  %v2033_v27 = vpop.eup %2032  ;;  %v932_v23 = vld [vmem:[#allocation17 + $0xa0] sm:$0xff]  ;;  %v934_v25 = vld [vmem:[#allocation17 + $0xb0] sm:$0xff]  ;;  %1765 = vmatprep.subr.bf16.mxu0 %v1764_v22 }
 0x321   : > { %v752_v29 = vmul.f32 %v2033_v27, %v1549_v21  ;;  %v928_v21 = vld [vmem:[#allocation17 + $0x80] sm:$0xff]  ;;  %v937_v27 = vld [vmem:[#allocation17 + $0xc8] sm:$0xff]  ;;  %v1766_v30 = vpack.c.bf16 %v934_v25, %v930_v24  ;;  %v970_v24 = vld [vmem:[#allocation17 + $0x1d0] sm:$0xff]  ;;  %v1784_v25 = vpack.c.bf16 %v975_v18, %v971_v17 }
 0x322   : > { %757 = vadd.xlane.f32.xlu1 %v751_v26  ;;  %v1734_v26 = vpack.c.bf16 %v932_v23, %v928_v21  ;;  %v1752_v21 = vpack.c.bf16 %v973_v16, %v969_v15  ;;  %v968_v22 = vld [vmem:[#allocation17 + $0x1c0] sm:$0xff]  ;;  %v1802_v15 = vpack.c.bf16 %v876_v12, %v872_v10  ;;  %v881_v17 = vld [vmem:[#allocation16 + $0x108] sm:$0xff] }
 0x323   : > { %1767 = vmatpush1.bf16.msra.mxu0 %v1766_v30  ;;  %v972_v23 = vld [vmem:[#allocation17 + $0x1e0] sm:$0xff]  ;;  %v855_v30 = vld [vmem:[#allocation16 + $0x38] sm:$0xff]  ;;  %v885_v18 = vld [vmem:[#allocation16 + $0x128] sm:$0xff] }
 0x324   : > { %755 = vadd.xlane.f32.xlu0 %v750_v28  ;;  %v941_v28 = vld [vmem:[#allocation17 + $0xe8] sm:$0xff]  ;;  %1735 = vmatpush1.bf16.msra.mxu1 %v1734_v26  ;;  %v974_v26 = vld [vmem:[#allocation17 + $0x1f0] sm:$0xff] }
 0x325   : > { %v1736_v31 = vpack.c.bf16 %v941_v28, %v937_v27  ;;  %v849_v27 = vld [vmem:[#allocation16 + $0x8] sm:$0xff] }
 0x326   : > { %759 = vadd.xlane.f32.xlu1 %v752_v29  ;;  %v939_v29 = vld [vmem:[#allocation17 + $0xd8] sm:$0xff]  ;;  %v853_v28 = vld [vmem:[#allocation16 + $0x28] sm:$0xff] }
 0x327   : > { %1737 = vmatprep.subr.bf16.mxu1 %v1736_v31  ;;  %v1754_v31 = vpack.c.bf16 %v972_v23, %v968_v22  ;;  %v880_v22 = vld [vmem:[#allocation16 + $0x100] sm:$0xff] }
 0x3ad   : > { %v754_v32 = vpop.xlane.xlu0 %753 }
 0x3ae   : > { %v771_v40 = vrot.slane %v754_v32, %v770_v35  ;;  %v943_v32 = vld [vmem:[#allocation17 + $0xf8] sm:$0xff] }
 0x3af   : > { %v758_v34 = vpop.xlane.xlu1 %757 }
 0x3b0   : > { %v782_v41 = vrot.slane %v758_v34, %v770_v35  ;;  %v940_v34 = vld [vmem:[#allocation17 + $0xe0] sm:$0xff]  ;;  %v1768_v35 = vpack.c.bf16 %v943_v32, %v939_v29  ;;  %v851_v29 = vld [vmem:[#allocation16 + $0x18] sm:$0xff]  ;;  %v1786_v32 = vpack.c.bf16 %v974_v26, %v970_v24  ;;  %v882_v26 = vld [vmem:[#allocation16 + $0x110] sm:$0xff] }
 0x3b1   : > { %v756_v36 = vpop.xlane.xlu0 %755 }
 0x3b2   : > { %v776_v37 = vrot.slane %v756_v36, %v775_v33  ;;  %v938_v36 = vld [vmem:[#allocation17 + $0xd0] sm:$0xff]  ;;  %1769 = vmatprep.subr.bf16.mxu0 %v1768_v35  ;;  %v852_v35 = vld [vmem:[#allocation16 + $0x20] sm:$0xff] }
 0x3b3   : > { %v760_v38 = vpop.xlane.xlu1 %759 }
 0x3b4   : > { %v786_v42 = vrot.slane %v760_v38, %v775_v33  ;;  %v778_v43 = vsel %vm777_vm1, %v776_v37, %v771_v40  ;;  %v936_v33 = vld [vmem:[#allocation17 + $0xc0] sm:$0xff]  ;;  %v942_v37 = vld [vmem:[#allocation17 + $0xf0] sm:$0xff]  ;;  %v945_v38 = vld [vmem:[#allocation17 + $0x108] sm:$0xff] }
 0x3b5   : > { %v949_v40 = vld [vmem:[#allocation17 + $0x128] sm:$0xff] }
 0x3b6   : > { %v787_v44 = vsel %vm777_vm1, %v786_v42, %v782_v41  ;;  %v947_v41 = vld [vmem:[#allocation17 + $0x118] sm:$0xff] }
 0x3b7   : > { %v789_v45 = vsel %vm788_vm2, %v787_v44, %v778_v43  ;;  %v951_v42 = vld [vmem:[#allocation17 + $0x138] sm:$0xff]  ;;  %v1738_v43 = vpack.c.bf16 %v940_v34, %v936_v33  ;;  %v1770_v44 = vpack.c.bf16 %v942_v37, %v938_v36  ;;  %v1788_v33 = vpack.c.bf16 %v853_v28, %v849_v27  ;;  %v848_v34 = vld [vmem:[#allocation16] sm:$0xff]  ;;  %v850_v36 = vld [vmem:[#allocation16 + $0x10] sm:$0xff] }
 0x3b8   : > { %v791_v46 = vsel %vm763_vm3, %v789_v45, -1e+30  ;;  %v1740_v45 = vpack.c.bf16 %v949_v40, %v945_v38  ;;  %v1820_v37 = vpack.c.bf16 %v855_v30, %v851_v29  ;;  %v854_v38 = vld [vmem:[#allocation16 + $0x30] sm:$0xff]  ;;  %v857_v40 = vld [vmem:[#allocation16 + $0x48] sm:$0xff] }
 0x3b9   : > { %v793_v47 = vsel %vm792_vm4, %v791_v46, -inf  ;;  %1739 = vmatpush1.bf16.msra.mxu1 %v1738_v43  ;;  %1771 = vmatpush1.bf16.msra.mxu0 %v1770_v44  ;;  %v863_v43 = vld [vmem:[#allocation16 + $0x78] sm:$0xff]  ;;  %v1790_v44 = vpack.c.bf16 %v852_v35, %v848_v34  ;;  %v886_v27 = vld [vmem:[#allocation16 + $0x130] sm:$0xff]  ;;  %v817_v35 = vsub.s32 1, %v2851_v0 }
 0x3ba   : > { %794 = vmax.xlane.f32.xlu0 %v793_v47  ;;  %v948_v47 = vld [vmem:[#allocation17 + $0x120] sm:$0xff]  ;;  %1741 = vmatprep.subr.bf16.mxu1 %v1740_v45  ;;  %v1822_v45 = vpack.c.bf16 %v854_v38, %v850_v36  ;;  %v1838_v30 = vpack.c.bf16 %v886_v27, %v882_v26 }
 0x3bb   : > { %v888_v38 = vld [vmem:[#allocation16 + $0x140] sm:$0xff] }
 0x447   : > { %v795_v48 = vpop.xlane.xlu0 %794 }
 0x448   : > { %v796_v49 = vsub.f32 %v791_v46, %v795_v48  ;;  %v944_v46 = vld [vmem:[#allocation17 + $0x100] sm:$0xff]  ;;  %v946_v48 = vld [vmem:[#allocation17 + $0x110] sm:$0xff] }
 0x449   : > { %v1742_v56 = vpack.c.bf16 %v948_v47, %v944_v46  ;;  %v856_v47 = vld [vmem:[#allocation16 + $0x40] sm:$0xff] }
 0x44a   : > { %v797_v50 = vmul.f32 1.442695, %v796_v49  ;;  %v1772_v49 = vpack.c.bf16 %v951_v42, %v947_v41  ;;  %v861_v41 = vld [vmem:[#allocation16 + $0x68] sm:$0xff]  ;;  %v859_v42 = vld [vmem:[#allocation16 + $0x58] sm:$0xff] }
 0x44b   : > { %1743 = vmatpush1.bf16.msra.mxu1 %v1742_v56  ;;  %v1792_v46 = vpack.c.bf16 %v861_v41, %v857_v40  ;;  %v865_v56 = vld [vmem:[#allocation16 + $0x88] sm:$0xff]  ;;  %v892_v40 = vld [vmem:[#allocation16 + $0x160] sm:$0xff] }
 0x44c   : > { %2034 = vpow2.f32 %v797_v50  ;;  %v950_v50 = vld [vmem:[#allocation17 + $0x130] sm:$0xff]  ;;  %1773 = vmatprep.subr.bf16.mxu0 %v1772_v49  ;;  %v1824_v49 = vpack.c.bf16 %v863_v43, %v859_v42  ;;  %v1810_v42 = vpack.c.bf16 %v892_v40, %v888_v38 }
 0x44d   : > { %v1774_v57 = vpack.c.bf16 %v950_v50, %v946_v48  ;;  %v860_v48 = vld [vmem:[#allocation16 + $0x60] sm:$0xff]  ;;  %v858_v50 = vld [vmem:[#allocation16 + $0x50] sm:$0xff] }
 0x44e   : > { %v894_v43 = vld [vmem:[#allocation16 + $0x170] sm:$0xff] }
 0x44f   : > { %1775 = vmatpush1.bf16.msra.mxu0 %v1774_v57  ;;  %v869_v57 = vld [vmem:[#allocation16 + $0xa8] sm:$0xff] }
 0x450   : > { %1777 = vmatprep.subr.bf16.mxu0 %v1776_v63  ;;  %v1796_v60 = vpack.c.bf16 %v869_v57, %v865_v56  ;;  %v868_v63 = vld [vmem:[#allocation16 + $0xa0] sm:$0xff]  ;;  %v898_v56 = vld [vmem:[#allocation16 + $0x190] sm:$0xff] }
 0x451   : > { %v902_v57 = vld [vmem:[#allocation16 + $0x1b0] sm:$0xff] }
 0x453   : > { %1779 = vmatpush1.bf16.msra.mxu0 %v1778_v8 }
 0x454   : > { %1781 = vmatprep.subr.bf16.mxu0 %v1780_v13  ;;  %v874_v13 = vld [vmem:[#allocation16 + $0xd0] sm:$0xff] }
 0x455   : > { %v1834_v16 = vpack.c.bf16 %v878_v14, %v874_v13 }
 0x456   : > { %v2862_v51 = vpop.eup %2034 }
 0x457   : > { %v799_v52 = vsel %vm792_vm4, %v2862_v51, 0.0  ;;  %1783 = vmatpush1.bf16.msra.mxu0 %v1782_v20  ;;  %v1804_v20 = vpack.c.bf16 %v885_v18, %v881_v17  ;;  %v828_v17 = vld [vmem:[#allocation5 + $0x10] sm:$0xff]  ;;  %v829_v18 = vld [vmem:[#allocation5 + $0x18] sm:$0xff] }
 0x458   : > { %800 = vadd.xlane.f32.xlu1 %v799_v52  ;;  %v953_v52 = vld [vmem:[#allocation17 + $0x148] sm:$0xff]  ;;  %1785 = vmatprep.subr.bf16.mxu0 %v1784_v25  ;;  %v884_v25 = vld [vmem:[#allocation16 + $0x120] sm:$0xff] }
 0x459   : > { %v1744_v58 = vpack.c.bf16 %v957_v53, %v953_v52  ;;  %v862_v52 = vld [vmem:[#allocation16 + $0x70] sm:$0xff]  ;;  %v1794_v53 = vpack.c.bf16 %v860_v48, %v856_v47  ;;  %v1806_v29 = vpack.c.bf16 %v884_v25, %v880_v22  ;;  %v899_v47 = vld [vmem:[#allocation16 + $0x198] sm:$0xff] }
 0x45a   : > { %v1826_v54 = vpack.c.bf16 %v862_v52, %v858_v50  ;;  %v903_v50 = vld [vmem:[#allocation16 + $0x1b8] sm:$0xff]  ;;  %v896_v52 = vld [vmem:[#allocation16 + $0x180] sm:$0xff] }
 0x45b   : > { %1745 = vmatprep.subr.bf16.mxu1 %v1744_v58  ;;  %1787 = vmatpush1.bf16.msra.mxu0 %v1786_v32  ;;  %v867_v58 = vld [vmem:[#allocation16 + $0x98] sm:$0xff]  ;;  %v893_v32 = vld [vmem:[#allocation16 + $0x168] sm:$0xff] }
 0x45c   : > { %1747 = vmatpush1.bf16.msra.mxu1 %v1746_v6  ;;  %1821 = vmatprep.subr.bf16.mxu0 %v1820_v37  ;;  %v1828_v62 = vpack.c.bf16 %v871_v61, %v867_v58  ;;  %v875_v6 = vld [vmem:[#allocation16 + $0xd8] sm:$0xff]  ;;  %v1846_v58 = vpack.c.bf16 %v902_v57, %v898_v56  ;;  %v909_v61 = vld [vmem:[#allocation16 + $0x1e8] sm:$0xff]  ;;  %v1307_v56 = vsub.s32 3, %v2851_v0 }
 0x45d   : > { %1749 = vmatprep.subr.bf16.mxu1 %v1748_v9  ;;  %v879_v9 = vld [vmem:[#allocation16 + $0xf8] sm:$0xff] }
 0x45e   : > { %1112 = vmatmul.mubr.f32.vlgmr.msra.gmra.mrb[2].mxu0 %v2847_v59  ;;  %v1832_v11 = vpack.c.bf16 %v879_v9, %v875_v6  ;;  %v895_v37 = vld [vmem:[#allocation16 + $0x178] sm:$0xff]  ;;  %v826_v9 = vld [vmem:[#allocation5] sm:$0xff] }
 0x45f   : > { %1823 = vmatpush1.bf16.msra.mxu0 %v1822_v45  ;;  %1257 = vmatprep.mubr.f32.mxu0 %v2428_v39  ;;  %v897_v45 = vld [vmem:[#allocation16 + $0x188] sm:$0xff] }
 0x460   : > { %1751 = vmatpush1.bf16.msra.mxu1 %v1750_v19  ;;  %1825 = vmatprep.subr.bf16.mxu0 %v1824_v49  ;;  %v883_v19 = vld [vmem:[#allocation16 + $0x118] sm:$0xff] }
 0x461   : > { %1753 = vmatprep.subr.bf16.mxu1 %v1752_v21  ;;  %v887_v21 = vld [vmem:[#allocation16 + $0x138] sm:$0xff] }
 0x462   : > { %v1836_v24 = vpack.c.bf16 %v887_v21, %v883_v19 }
 0x463   : > { %1827 = vmatpush1.bf16.msra.mxu0 %v1826_v54  ;;  %v1844_v54 = vpack.c.bf16 %v903_v50, %v899_v47 }
 0x464   : > { %1755 = vmatpush1.bf16.msra.mxu1 %v1754_v31  ;;  %1829 = vmatprep.subr.bf16.mxu0 %v1828_v62  ;;  %v889_v31 = vld [vmem:[#allocation16 + $0x148] sm:$0xff] }
 0x465   : > { %1789 = vmatprep.subr.bf16.mxu1 %v1788_v33  ;;  %v891_v33 = vld [vmem:[#allocation16 + $0x158] sm:$0xff]  ;;  %v1808_v36 = vpack.c.bf16 %v893_v32, %v889_v31 }
 0x466   : > { %v1840_v41 = vpack.c.bf16 %v895_v37, %v891_v33 }
 0x467   : > { %1041 = vmatmul.mubr.f32.vlgmr.msra.gmra.mrb[0].mxu1 %v2847_v59  ;;  %v864_v59 = vld [vmem:[#allocation16 + $0x80] sm:$0xff]  ;;  %1831 = vmatpush1.bf16.msra.mxu0 %v1830_v4  ;;  %v1818_v4 = vpack.c.bf16 %v908_v2, %v904_v1 }
 0x468   : > { %1791 = vmatpush1.bf16.msra.mxu1 %v1790_v44  ;;  %1186 = vmatprep.mubr.f32.mxu1 %v2428_v39  ;;  %v1798_v3 = vpack.c.bf16 %v868_v63, %v864_v59  ;;  %v877_v39 = vld [vmem:[#allocation16 + $0xe8] sm:$0xff]  ;;  %v907_v59 = vld [vmem:[#allocation16 + $0x1d8] sm:$0xff] }
 0x469   : > { %1793 = vmatprep.subr.bf16.mxu1 %v1792_v46  ;;  %v1800_v8 = vpack.c.bf16 %v877_v39, %v873_v5  ;;  %1833 = vmatprep.subr.bf16.mxu0 %v1832_v11  ;;  %v901_v46 = vld [vmem:[#allocation16 + $0x1a8] sm:$0xff]  ;;  %v911_v63 = vld [vmem:[#allocation16 + $0x1f8] sm:$0xff]  ;;  %v906_v5 = vld [vmem:[#allocation16 + $0x1d0] sm:$0xff] }
 0x46a   : > { %v1812_v49 = vpack.c.bf16 %v901_v46, %v897_v45  ;;  %v910_v39 = vld [vmem:[#allocation16 + $0x1f0] sm:$0xff] }
 0x46b   : > { %1835 = vmatpush1.bf16.msra.mxu0 %v1834_v16  ;;  %v1850_v6 = vpack.c.bf16 %v910_v39, %v906_v5 }
 0x46c   : > { %1795 = vmatpush1.bf16.msra.mxu1 %v1794_v53  ;;  %1837 = vmatprep.subr.bf16.mxu0 %v1836_v24  ;;  %v900_v53 = vld [vmem:[#allocation16 + $0x1a0] sm:$0xff] }
 0x46d   : > { %1797 = vmatprep.subr.bf16.mxu1 %v1796_v60  ;;  %v905_v60 = vld [vmem:[#allocation16 + $0x1c8] sm:$0xff] }
 0x46e   : > { %v1816_v62 = vpack.c.bf16 %v909_v61, %v905_v60 }
 0x46f   : > { %1839 = vmatpush1.bf16.msra.mxu0 %v1838_v30 }
 0x470   : > { %1799 = vmatpush1.bf16.msra.mxu1 %v1798_v3  ;;  %1841 = vmatprep.subr.bf16.mxu0 %v1840_v41  ;;  %v1848_v3 = vpack.c.bf16 %v911_v63, %v907_v59  ;;  %v1264_v41 = vld [vmem:[%s2819_s27] sm:$0xff]  ;;  %s2431_s27 = smov [#allocation20]  }
 0x471   : > { %1801 = vmatprep.subr.bf16.mxu1 %v1800_v8  ;;  %v827_v8 = vld [vmem:[#allocation5 + $0x8] sm:$0xff]  ;;  %s2312_s20 = sshll.u32 %s2431_s27, 4  ;;  %s2313_s20 = int_to_ptr.vmem [resolvable:$false] %s2312_s20 }
 0x472   : > { %s2314_s21 = scalar_lea.vmem %s2313_s20, 64  ;;  %p2315_p4 = scmp.lt.s32.totalorder %s2889_s29, %s2313_s20 }
 0x473   : > { %p2316_p8 = scmp.lt.s32.totalorder %s2314_s21, %s2308_s19 }
 0x474   : > { %1803 = vmatpush1.bf16.msra.mxu1 %v1802_v15 }
 0x475   : > { %1805 = vmatprep.subr.bf16.mxu1 %v1804_v20  ;;  %p2317_p10 = por %p2316_p8, %p2315_p4 }
 0x477   : > { %p2318_p12 = pnand %p2317_p10, %p2311_p1 }
 0x478   : > { %1807 = vmatpush1.bf16.msra.mxu1 %v1806_v29 }
 0x479   : > { %1809 = vmatprep.subr.bf16.mxu1 %v1808_v36  ;;  %v2430_v36 = vmov 1983009808  }
 0x47a   : > { %v1268_v37 = vunpack.c.l.s4 %v2430_v36 }
 0x47c   : > { %1811 = vmatpush1.bf16.msra.mxu1 %v1810_v42  ;;  %v1269_v38 = vunpack.c.0.s8 %v1268_v37 }
 0x47d   : > { %1813 = vmatprep.subr.bf16.mxu1 %v1812_v49 }
 0x47e   : > { %v1272_v40 = vsub.s32 %v1269_v38, %v2851_v0 }
 0x480   : > { %v1273_v42 = vrot.slane %v1264_v41, %v1272_v40 }
 0x482   : > { %v1281_v45 = vcombine.high %v1273_v42, %v1273_v42 }
 0x4e5   : > { %v801_v55 = vpop.xlane.xlu1 %800 }
 0x4e6   : > { %2036 = vrcp.f32 %v801_v55  ;;  %v1814_v55 = vpack.c.bf16 %v900_v53, %v896_v52 }
 0x4e8   : > { %1815 = vmatpush1.bf16.msra.mxu1 %v1814_v55 }
 0x4e9   : > { %1817 = vmatprep.subr.bf16.mxu1 %v1816_v62 }
 0x4ec   : > { %1819 = vmatpush1.bf16.msra.mxu1 %v1818_v4 }
 0x4f0   : > { %v2037_v23 = vpop.eup %2036 }
 0x4f1   : > { %v803_v28 = vmul.f32 %v2037_v23, %v2862_v51  ;;  %v890_v51 = vld [vmem:[#allocation16 + $0x150] sm:$0xff] }
 0x4f2   : > { %v1842_v44 = vpack.c.bf16 %v894_v43, %v890_v51  ;;  %v1266_v51 = vcombine.high %v1264_v41, %v1264_v41  ;;  %v1291_v43 = vld [vmem:[#allocation19] sm:$0xf] }
 0x4f3   : > { %v807_v34 = vrot.slane %v803_v28, %v2855_v7  ;;  %v818_v48 = vrot.slane %v803_v28, %v817_v35  ;;  %v1296_v46 = vrot.slane %v1291_v43, %v2855_v7  ;;  %v1300_v49 = vrot.slane %v1291_v43, %v817_v35 }
 0x4f4   : > { %1843 = vmatpush1.bf16.msra.mxu0 %v1842_v44  ;;  %v1280_v44 = vrot.slane %v1266_v51, %v1272_v40  ;;  %v1308_v62 = vrot.slane %v1291_v43, %v1307_v56  ;;  %v1303_v7 = vsub.s32 2, %v2851_v0 }
 0x4f5   : > { %813 = vbcast.lane.b32.xlu1 %v807_v34, 264  ;;  %809 = vbcast.lane.b32.xlu0 %v807_v34, 256 }
 0x4f6   : > { %1845 = vmatprep.subr.bf16.mxu0 %v1844_v54  ;;  %v1282_v55 = vcombine.high %v1280_v44, %v1280_v44  ;;  %v1304_v35 = vrot.slane %v1291_v43, %v1303_v7 }
 0x4f8   : > { %1847 = vmatpush1.bf16.msra.mxu0 %v1846_v58 }
 0x4f9   : > { %820 = vbcast.lane.b32.xlu1 %v818_v48, 256  ;;  %1849 = vmatprep.subr.bf16.mxu0 %v1848_v3 }
 0x4fc   : > { %1851 = vmatpush1.bf16.msra.mxu0 %v1850_v6 }
 0x4fd   : > { %824 = vbcast.lane.b32.xlu1 %v818_v48, 264 }
 0x567   : > { %v814_v10 = vpop.permute.xlu1 %813  ;;  %v810_v11 = vpop.permute.xlu0 %809 }
 0x568   : > { %v831_v12 = vmul.f32 %v827_v8, %v814_v10  ;;  %v830_v13 = vmul.f32 %v826_v9, %v810_v11  ;;  %v603_v10 = vld [vmem:[#allocation4] sm:$0x3] }
 0x56a   : > { %v834_v14 = vadd.f32 %v831_v12, %v830_v13 }
 0x56b   : > { %v821_v15 = vpop.permute.xlu1 %820 }
 0x56c   : > { %v835_v16 = vrot.slane %v834_v14, 4  ;;  %v832_v21 = vmul.f32 %v828_v17, %v821_v15 }
 0x56e   : > { %v836_v19 = vadd.f32 %v835_v16, %v834_v14 }
 0x56f   : > { %v825_v20 = vpop.permute.xlu1 %824 }
 0x570   : > { %v833_v22 = vmul.f32 %v829_v18, %v825_v20  ;;  %v837_v23 = vrot.slane %v836_v19, 2 }
 0x572   : > { %v841_v24 = vadd.f32 %v833_v22, %v832_v21  ;;  %v838_v26 = vadd.f32 %v837_v23, %v836_v19 }
 0x574   : > { %v842_v25 = vrot.slane %v841_v24, 4  ;;  %v839_v29 = vrot.slane %v838_v26, 1 }
 0x576   : > { %v843_v27 = vadd.f32 %v842_v25, %v841_v24  ;;  %v840_v32 = vadd.f32 %v839_v29, %v838_v26 }
 0x578   : > { %v844_v28 = vrot.slane %v843_v27, 2 }
 0x57a   : > { %v845_v30 = vadd.f32 %v844_v28, %v843_v27 }
 0x57c   : > { %v846_v31 = vrot.slane %v845_v30, 1 }
 0x57e   : > { %v847_v33 = vadd.f32 %v846_v31, %v845_v30 }
 0x580   : > { %v1120_v34 = vsel %vm788_vm2, %v847_v33, %v840_v32 }
 0x581   : > { %1187 = vmatmul.mubr.f32.vlgmr.msra.gmra.mrb[0].mxu1 %v1120_v34  ;;  %1258 = vmatmul.mubr.f32.vlgmr.msra.gmra.mrb[2].mxu0 %v1120_v34 }
 0x654   : > { %v1188_v47 = vpop.f32.mrb[0].mxu1  ;;  %v1259_v48 = vpop.f32.mrb[2].mxu0 }
 0x655   : > { %v1287_v50 = vadd.f32 %v1273_v42, %v1188_v47  ;;  %v1190_v52 = vpop.f32.mrb[1].mxu1  ;;  %v1261_v53 = vpop.f32.mrb[3].mxu0  ;;  %v1289_v1 = vadd.f32 %v1280_v44, %v1259_v48 }
 0x656   : > { %v1288_v54 = vadd.f32 %v1281_v45, %v1190_v52  ;;  %v1290_v59 = vadd.f32 %v1282_v55, %v1261_v53 }
 0x657   : > { %v1313_v57 = vadd.f32 %v1296_v46, %v1287_v50  ;;  %v1315_v3 = vadd.f32 %v1304_v35, %v1289_v1 }
 0x658   : > { %v1314_v58 = vadd.f32 %v1300_v49, %v1288_v54  ;;  %v1316_v63 = vadd.f32 %v1308_v62, %v1290_v59 }
 0x659   : > { %v1550_v60 = vmul.f32 -1.442695, %v1313_v57 }
 0x65a   : > { %v1551_v61 = vmul.f32 -1.442695, %v1314_v58  ;;  %v1552_v2 = vmul.f32 -1.442695, %v1316_v63 }
 0x65b   : > { %2038 = vpow2.f32 %v1550_v60 }
 0x65c   : > { %2040 = vpow2.f32 %v1551_v61 }
 0x65d   : > { %2042 = vpow2.f32 %v1552_v2 }
 0x65e   : > { %2044 = vtanh.f32 %v1315_v3 }
 0x665   : > { %v2039_v4 = vpop.eup %2038 }
 0x666   : > { %v2041_v5 = vpop.eup %2040  ;;  %v1320_v39 = vadd.f32 1.0, %v2039_v4 }
 0x667   : > { %v1326_v6 = vadd.f32 1.0, %v2041_v5  ;;  %v2043_v8 = vpop.eup %2042 }
 0x668   : > { %2046 = vrcp.f32 %v1320_v39  ;;  %v2045_v9 = vpop.eup %2044  ;;  %v1333_v13 = vadd.f32 1.0, %v2043_v8 }
 0x669   : > { %2048 = vrcp.f32 %v1326_v6 }
 0x66a   : > { %2050 = vrcp.f32 %v1333_v13 }
 0x672   : > { %v2047_v0 = vpop.eup %2046 }
 0x673   : > { %v2049_v11 = vpop.eup %2048  ;;  %v1337_v12 = vmul.f32 %v2047_v0, %v2045_v9 }
 0x674   : > { %v1336_v14 = vmul.f32 %v2049_v11, %v603_v10  ;;  %v2051_v16 = vpop.eup %2050 }
 0x676   : > { %v1338_v15 = vadd.f32 %v1337_v12, %v1336_v14 }
 0x678   : > { %2052 = vtanh.f32 %v1338_v15  ;;  %1342 = vst [vmem:[#allocation4] sm:$0x3] %v1338_v15 }
 0x682   : > { %v2053_v17 = vpop.eup %2052 }
 0x683   : > { %v1340_v18 = vmul.f32 %v2053_v17, %v2051_v16 }
 0x685   : > { %1341 = vst [vmem:[#allocation3] sm:$0x3] %v1340_v18  ;;  %1343 = vst [vmem:[%s2842_s9] sm:$0x3] %v1340_v18 }
 0x686   : > { %2321 = shalt.err (!%p2318_p12)
}
 0x687   : > { %s2322_s28 = scalar_lea.hbm %s2887_s12, 32  ;;  %s2326_s17 = scalar_lea.hbm %s2985_s0, 160 }
 0x688   : > { %p2323_p9 = scmp.ne.s32.totalorder %s2887_s12, %s2322_s28  ;;  %p2327_p6 = scmp.lt.u32.totalorder %s2887_s12, %s2985_s0 }
 0x689   : > { %p2328_p3 = scmp.lt.u32.totalorder %s2326_s17, %s2322_s28  ;;  %p2330_p5 = scmp.lt.u32.totalorder %s2322_s28, %s2887_s12 }
 0x68a   : > { %p2324_p11 = pnand %p2323_p9, %p2986_p2 }
 0x68b   : > { %p2329_p13 = por %p2328_p3, %p2327_p6 }
 0x68c   : > { %p2325_p7 = pneg %p2324_p11 }
 0x68d   : > { %p2331_p0 = por %p2330_p5, %p2329_p13 }
 0x68f   : > { %p2332_p1 = pnand %p2331_p0, %p2325_p7 }
 0x691   : > { %2335 = shalt.err (!%p2332_p1)
}
 0x692   : > { %1906 = dma.vmem_to_hbm [thread:$0]  (%p2986_p2), %s2889_s29, 32, %s2887_s12, %s1345_s18  }
 0x693 PF: > { %p1958_p4 = scmp.ge.s32.totalorder %s2410_s14, 2  ;;  %s1371_s19 = sand.u32 1, %s2390_s30  }
 0x694   : > { %p2987_p8 = scmp.ne.s32.totalorder %s2969_s26, 0  ;;  %s1372_s27 = scalar_lea.sflag [#allocation7], %s1371_s19 }
 0x696   : > { %p1938_p10 = pnand %p1958_p4, %p2987_p8 }
 0x698   : > { %2385 = dma.done.wait (!%p1938_p10), %s1372_s27, 32  }
 0x699   : > { %2387 = vsyncadd (!%p1938_p10), %s1372_s27, 4294967264  ;;  %s29_s14 = sadd.s32 1, %s2410_s14   ;;  %s2988_s30 = smov %s2394_s10 }
 0x69a   : > { %p26_p12 = scmp.ge.s32.totalorder %s29_s14, 7   ;;  %s2989_s10 = smov %s2398_s11 }
 0x69b   : > { %s2990_s11 = smov %s2760_s16  ;;  %s2991_s12 = smov %s2406_s13 }
 0x69c   : > { %s2992_s13 = smov %s2994_s25  ;;  %28 = sbr.rel (!%p26_p12) target bundleno = 13 (0xd), region = 139 }
 0x6a3   :  { %1377 = vsyncpa [#allocation6], 1 }
 0x6a4   :  { %1379 = vsyncpa [#allocation6 + $0x1], 1 }
 0x6a5   :  { %1380 = vsyncpa [#allocation9], 1 }
 0x6a6   :  { %1382 = vsyncpa [#allocation9 + $0x1], 1 }
 0x6a7   :  { %1383 = vsyncpa [#allocation12], 1 }
 0x6a8   :  { %1384 = vsyncpa [#allocation15], 1 }
 0x6a9   :  { %1385 = vsyncpa [#allocation18], 1 }
 0x6aa   :  { %1386 = vsyncpa [#allocation7], 1 }
 0x6ab   :  { %1388 = vsyncpa [#allocation7 + $0x1], 1 }

</bundles_post_ra>
